<compile_context>
chip_gen: v7x
topology: tpu7x:2x2x1
jax: 0.10.0
libtpu: 0.0.40
codegen_flags: <defaults>
</compile_context>

<pallas_src>
import functools

import jax
import jax.numpy as jnp
import numpy as np
from jax.experimental import pallas as pl
from jax.experimental.pallas import tpu as pltpu

NEG_SLOPE = 0.2   # DGL GATConv default LeakyReLU negative slope
BN_EPS = 1e-5     # nn.BatchNorm1d default eps


# ---------------------------------------------------------------------------
# Shared GATConv core: projection (once per layer) + per-(tile, chunk) attention
# ---------------------------------------------------------------------------
def _gat_core(x_ref, w_ref, al_ref, ar_ref, adj_ref,
              zaug_sc, el_sc, er_sc, elmax_sc, r_sc,
              *, num_heads, out_feats, tile_m, tile_n, n_chunks):
    H, D = num_heads, out_feats
    i = pl.program_id(0)      # destination-row tile
    k = pl.program_id(1)      # source-column chunk

    # ---- once per layer: dense projection, attention scores, blockdiag [z|1] ----
    @pl.when(jnp.logical_and(i == 0, k == 0))
    def _():
        x = x_ref[...].astype(jnp.bfloat16)
        z = jnp.dot(x, w_ref[...].astype(jnp.bfloat16),
                    preferred_element_type=jnp.float32)                 # (Np, H*D)
        el = jnp.dot(z, al_ref[...], preferred_element_type=jnp.float32)  # (Np, H) src
        er = jnp.dot(z, ar_ref[...], preferred_element_type=jnp.float32)  # (Np, H) dst
        er_sc[...] = er
        elmax_sc[...] = jnp.max(el, axis=0, keepdims=True)              # (1, H)
        el_t = el.T                                                      # (H, Np) once
        for kc in range(n_chunks):
            el_sc[kc] = el_t[:, kc * tile_n:(kc + 1) * tile_n]
            for h in range(H):
                # row block h of blockdiag([z_h | onehot_h]) for this source chunk,
                # built with full-lane stores (no masked partial stores).
                zh = z[kc * tile_n:(kc + 1) * tile_n, h * D:(h + 1) * D]
                head_ids = jax.lax.broadcasted_iota(jnp.int32, (tile_n, H), 1)
                ones_blk = (head_ids == h).astype(jnp.float32)           # denominator cols
                parts = []
                if h > 0:
                    parts.append(jnp.zeros((tile_n, h * D), jnp.float32))
                parts.append(zh)
                if h < H - 1:
                    parts.append(jnp.zeros((tile_n, (H - 1 - h) * D), jnp.float32))
                parts.append(ones_blk)
                zaug_sc[kc, h * tile_n:(h + 1) * tile_n, :] = (
                    jnp.concatenate(parts, axis=-1).astype(jnp.bfloat16))

    @pl.when(k == 0)
    def _():
        r_sc[...] = jnp.zeros_like(r_sc)

    # ---- per (dest tile, source chunk) ----
    row0 = pl.multiple_of(i * tile_m, tile_m)
    adj = adj_ref[...].astype(jnp.float32)                               # (tile_m, tile_n)
    er = er_sc[pl.ds(row0, tile_m), :]                                   # (tile_m, H)
    # closed-form per-row softmax shift: LeakyReLU is monotone, so
    # max_src leaky(er + el[src]) == leaky(er + max_src el).  The shift cancels
    # between numerator and denominator (note: max over ALL nodes, not edges only).
    m = er + elmax_sc[...]
    m = jnp.maximum(m, NEG_SLOPE * m)
    el = el_sc[k]                                                        # (H, tile_n)

    ps = []
    for h in range(H):
        e = er[:, h:h + 1] + el[h:h + 1, :]                              # e[dst, src]
        e = jnp.maximum(e, NEG_SLOPE * e)                                # LeakyReLU(0.2)
        ps.append(jnp.exp(e - m[:, h:h + 1]) * adj)                      # masked, unnormalized
    p_cat = ps[0] if H == 1 else jnp.concatenate(ps, axis=-1)            # (tile_m, H*tile_n)
    # one bf16 MXU matmul gives all per-head aggregates AND denominators, lane-dense
    r_sc[...] += jnp.dot(p_cat.astype(jnp.bfloat16), zaug_sc[k],
                         preferred_element_type=jnp.float32)             # (tile_m, H*D + H)


def _normalize_heads(r, num_heads, out_feats):
    """Deferred softmax normalization: [agg | denom] -> concat_h(agg_h / denom_h)."""
    H, D = num_heads, out_feats
    outs = []
    for h in range(H):
        denom = r[:, H * D + h:H * D + h + 1]
        # 1e-9 clamp: zero-in-degree (and padded) rows map to ~0 instead of erroring
        # like DGL; approx reciprocal is the EUP fast path (~1e-3 rel error).
        inv = pl.reciprocal(jnp.maximum(denom, 1e-9), approx=True)
        outs.append(r[:, h * D:(h + 1) * D] * inv)
    return outs[0] if H == 1 else jnp.concatenate(outs, axis=-1)         # (tile_m, H*D)


# ---------------------------------------------------------------------------
# Fused layer kernels
# ---------------------------------------------------------------------------
def _gat_bn_relu_kernel(x_ref, w_ref, al_ref, ar_ref, adj_ref, scale_ref, shift_ref,
                        out_ref, zaug_sc, el_sc, er_sc, elmax_sc, r_sc,
                        *, num_heads, out_feats, tile_m, tile_n, n_chunks):
    """GATConv + flatten + (GAT bias folded with eval BatchNorm1d) + ReLU."""
    _gat_core(x_ref, w_ref, al_ref, ar_ref, adj_ref,
              zaug_sc, el_sc, er_sc, elmax_sc, r_sc,
              num_heads=num_heads, out_feats=out_feats,
              tile_m=tile_m, tile_n=tile_n, n_chunks=n_chunks)

    @pl.when(pl.program_id(1) == pl.num_programs(1) - 1)
    def _():
        node = _normalize_heads(r_sc[...], num_heads, out_feats)
        y = node * scale_ref[...] + shift_ref[...]                       # bias ⊕ eval-BN affine
        out_ref[...] = jnp.maximum(y, 0.0).astype(out_ref.dtype)         # ReLU (+dropout=id)


def _gat_pool_cls_kernel(x_ref, w_ref, al_ref, ar_ref, adj_ref, bias_ref, poolt_ref,
                         wc_ref, bc_ref, out_ref,
                         zaug_sc, el_sc, er_sc, elmax_sc, r_sc, hg_sc,
                         *, out_feats, tile_m, tile_n, n_chunks):
    """Last GATConv (1 head) + squeeze + SumPooling + Linear classifier."""
    i = pl.program_id(0)
    k = pl.program_id(1)
    last_k = pl.num_programs(1) - 1

    @pl.when(jnp.logical_and(i == 0, k == 0))
    def _():
        hg_sc[...] = jnp.zeros_like(hg_sc)

    _gat_core(x_ref, w_ref, al_ref, ar_ref, adj_ref,
              zaug_sc, el_sc, er_sc, elmax_sc, r_sc,
              num_heads=1, out_feats=out_feats,
              tile_m=tile_m, tile_n=tile_n, n_chunks=n_chunks)

    @pl.when(k == last_k)
    def _():
        node = _normalize_heads(r_sc[...], 1, out_feats) + bias_ref[...]  # (tile_m, D)
        # SumPooling contribution of this dest tile: hg += pool_tile^T @ node.
        # TODO(synk): with tile_m >= 128 a (B, tile_m) pool block + plain jnp.dot is the
        #             natural MXU orientation; the transposed tile keeps small demo tiles
        #             legal under the (8,128) BlockSpec rule.
        hg_sc[...] += jax.lax.dot_general(
            poolt_ref[...], node, dimension_numbers=(((0,), (0,)), ((), ())),
            preferred_element_type=jnp.float32)                           # (B, D)

    @pl.when(jnp.logical_and(i == pl.num_programs(0) - 1, k == last_k))
    def _():
        out_ref[...] = (jnp.dot(hg_sc[...], wc_ref[...],
                                preferred_element_type=jnp.float32) + bc_ref[...])


# ---------------------------------------------------------------------------
# pallas_call wrappers
# ---------------------------------------------------------------------------
def _compiler_params():
    try:
        cap = int(pltpu.get_tpu_info().vmem_capacity_bytes)
        vmem_limit = (cap * 3) // 4     # ~96 MiB on v5e/v6e, ~48 MiB on v7x
    except Exception:
        vmem_limit = None
    # Both axes "arbitrary": grid step (0,0) fills scratch shared by every later
    # tile, and outputs / pooled sums accumulate across the source-chunk axis.
    return pltpu.CompilerParams(dimension_semantics=("arbitrary", "arbitrary"),
                                vmem_limit_bytes=vmem_limit)


def _choose_tiles(n, tile_m=None, tile_n=None):
    """Power-of-two tiles; N is zero-padded so both tile sizes divide it."""
    np2 = pl.next_power_of_2(max(int(n), 8))
    tile_m = min(256, np2) if tile_m is None else pl.next_power_of_2(max(int(tile_m), 8))
    tile_n = (min(512, max(128, np2)) if tile_n is None
              else pl.next_power_of_2(max(int(tile_n), 128)))
    step = max(tile_m, tile_n)
    n_pad = pl.cdiv(n, step) * step
    return min(tile_m, n_pad), min(tile_n, n_pad), n_pad


def gat_conv_bn_relu(x, adj, layer, bn, tile_m, tile_n):
    n_pad, fin = x.shape
    H, D = layer["num_heads"], layer["out_feats"]
    C = H * D
    n_tiles, n_chunks = n_pad // tile_m, n_pad // tile_n
    # fold GATConv bias + eval-mode BatchNorm1d into one affine (host side)
    scale = bn["gamma"] * jax.lax.rsqrt(bn["var"] + BN_EPS)               # (1, C)
    shift = (layer["bias2d"] - bn["mean"]) * scale + bn["beta"]           # (1, C)

    kernel = functools.partial(_gat_bn_relu_kernel, num_heads=H, out_feats=D,
                               tile_m=tile_m, tile_n=tile_n, n_chunks=n_chunks)
    grid_spec = pltpu.PrefetchScalarGridSpec(
        num_scalar_prefetch=0,
        grid=(n_tiles, n_chunks),
        in_specs=[
            pl.BlockSpec((n_pad, fin), lambda i, k: (0, 0)),              # x (resident)
            pl.BlockSpec(layer["w"].shape, lambda i, k: (0, 0)),          # W
            pl.BlockSpec(layer["al_mat"].shape, lambda i, k: (0, 0)),     # attn_l (blk diag)
            pl.BlockSpec(layer["ar_mat"].shape, lambda i, k: (0, 0)),     # attn_r (blk diag)
            pl.BlockSpec((tile_m, tile_n), lambda i, k: (i, k)),          # adj block (bf16)
            pl.BlockSpec((1, C), lambda i, k: (0, 0)),                    # folded scale
            pl.BlockSpec((1, C), lambda i, k: (0, 0)),                    # folded shift
        ],
        out_specs=pl.BlockSpec((tile_m, C), lambda i, k: (i, 0)),
        scratch_shapes=[
            pltpu.VMEM((n_chunks, H * tile_n, C + H), jnp.bfloat16),      # blockdiag [z | 1]
            pltpu.VMEM((n_chunks, H, tile_n), jnp.float32),               # el (src scores)
            pltpu.VMEM((n_pad, H), jnp.float32),                          # er (dst scores)
            pltpu.VMEM((1, H), jnp.float32),                              # max_src el per head
            pltpu.VMEM((tile_m, C + H), jnp.float32),                     # [agg | denom] acc
        ],
    )
    return pl.pallas_call(
        kernel,
        out_shape=jax.ShapeDtypeStruct((n_pad, C), jnp.bfloat16),         # bf16 activations
        grid_spec=grid_spec,
        compiler_params=_compiler_params(),
    )(x, layer["w"], layer["al_mat"], layer["ar_mat"], adj, scale, shift)


def gat_pool_classify(x, adj, pool_t, layer, cls_w, cls_b, tile_m, tile_n):
    n_pad, fin = x.shape
    D = layer["out_feats"]
    B = pool_t.shape[1]
    out_dim = cls_w.shape[1]
    n_tiles, n_chunks = n_pad // tile_m, n_pad // tile_n

    kernel = functools.partial(_gat_pool_cls_kernel, out_feats=D,
                               tile_m=tile_m, tile_n=tile_n, n_chunks=n_chunks)
    grid_spec = pltpu.PrefetchScalarGridSpec(
        num_scalar_prefetch=0,
        grid=(n_tiles, n_chunks),
        in_specs=[
            pl.BlockSpec((n_pad, fin), lambda i, k: (0, 0)),              # x
            pl.BlockSpec(layer["w"].shape, lambda i, k: (0, 0)),          # W
            pl.BlockSpec(layer["al_mat"].shape, lambda i, k: (0, 0)),
            pl.BlockSpec(layer["ar_mat"].shape, lambda i, k: (0, 0)),
            pl.BlockSpec((tile_m, tile_n), lambda i, k: (i, k)),          # adj block (bf16)
            pl.BlockSpec((1, D), lambda i, k: (0, 0)),                    # GATConv bias
            pl.BlockSpec((tile_m, B), lambda i, k: (i, 0)),               # pool^T tile
            pl.BlockSpec(cls_w.shape, lambda i, k: (0, 0)),               # classifier W
            pl.BlockSpec((1, out_dim), lambda i, k: (0, 0)),              # classifier b
        ],
        out_specs=pl.BlockSpec((B, out_dim), lambda i, k: (0, 0)),
        scratch_shapes=[
            pltpu.VMEM((n_chunks, tile_n, D + 1), jnp.bfloat16),          # [z | 1]
            pltpu.VMEM((n_chunks, 1, tile_n), jnp.float32),               # el
            pltpu.VMEM((n_pad, 1), jnp.float32),                          # er
            pltpu.VMEM((1, 1), jnp.float32),                              # max el
            pltpu.VMEM((tile_m, D + 1), jnp.float32),                     # [agg | denom] acc
            pltpu.VMEM((B, D), jnp.float32),                              # pooled accumulator
        ],
    )
    return pl.pallas_call(
        kernel,
        out_shape=jax.ShapeDtypeStruct((B, out_dim), jnp.float32),
        grid_spec=grid_spec,
        compiler_params=_compiler_params(),
    )(x, layer["w"], layer["al_mat"], layer["ar_mat"], adj, layer["bias2d"],
      pool_t, cls_w, cls_b)


# ---------------------------------------------------------------------------
# deterministic parameter init (shapes follow the PyTorch __init__)
# ---------------------------------------------------------------------------
def _block_diag_attn(attn):
    # attn: (H, D) -> (H*D, H) block diagonal, so z @ A gives per-head <z_h, a_h>
    H, D = attn.shape
    A = np.zeros((H * D, H), dtype=np.float32)
    attn_np = np.asarray(attn)
    for h in range(H):
        A[h * D:(h + 1) * D, h] = attn_np[h]
    return jnp.asarray(A)


def _init_gat_layer(key, in_feats, out_feats, num_heads):
    k_w, k_l, k_r = jax.random.split(key, 3)
    scale = 1.0 / np.sqrt(in_feats)
    w = jax.random.normal(k_w, (in_feats, num_heads * out_feats), jnp.float32) * scale
    attn_l = jax.random.normal(k_l, (num_heads, out_feats), jnp.float32) * 0.1
    attn_r = jax.random.normal(k_r, (num_heads, out_feats), jnp.float32) * 0.1
    bias = jnp.zeros((1, num_heads * out_feats), jnp.float32)
    return dict(w=w, al_mat=_block_diag_attn(attn_l), ar_mat=_block_diag_attn(attn_r),
                bias2d=bias, num_heads=num_heads, out_feats=out_feats)


def _init_bn(c):
    # PyTorch defaults: gamma=1, beta=0, running_mean=0, running_var=1
    return dict(gamma=jnp.ones((1, c), jnp.float32), beta=jnp.zeros((1, c), jnp.float32),
                mean=jnp.zeros((1, c), jnp.float32), var=jnp.ones((1, c), jnp.float32))


def init_gat_classifier(key, in_feats, hidden_dim, out_dim, num_layers=3, num_heads=4):
    keys = jax.random.split(key, num_layers + 1)
    layers, bns = [], []
    layers.append(_init_gat_layer(keys[0], in_feats, hidden_dim, num_heads))
    bns.append(_init_bn(hidden_dim * num_heads))
    for i in range(num_layers - 2):
        layers.append(_init_gat_layer(keys[i + 1], hidden_dim * num_heads, hidden_dim, num_heads))
        bns.append(_init_bn(hidden_dim * num_heads))
    layers.append(_init_gat_layer(keys[num_layers - 1], hidden_dim * num_heads, hidden_dim, 1))
    scale = 1.0 / np.sqrt(hidden_dim)
    cls_w = jax.random.normal(keys[num_layers], (hidden_dim, out_dim), jnp.float32) * scale
    cls_b = jnp.zeros((1, out_dim), jnp.float32)
    return dict(layers=layers, bns=bns, cls_w=cls_w, cls_b=cls_b)


def gat_classifier_forward(params, adj, pool, x, tile_m=None, tile_n=None):
    # TODO(synk): training-mode BatchNorm batch statistics and stochastic Dropout are
    # not implemented; eval-mode semantics (running stats, identity dropout) are used.
    n = x.shape[0]
    b = pool.shape[0]
    tile_m, tile_n, n_pad = _choose_tiles(n, tile_m, tile_n)
    # zero-pad the graph to the tile grid: padded nodes have no incoming/outgoing
    # edges and zero pool weight, so they never contribute to real rows or to hg.
    adj_p = jnp.zeros((n_pad, n_pad), jnp.bfloat16).at[:n, :n].set(adj.astype(jnp.bfloat16))
    pool_t = jnp.zeros((n_pad, b), jnp.float32).at[:n, :].set(pool.T.astype(jnp.float32))
    h = jnp.zeros((n_pad, x.shape[1]), x.dtype).at[:n, :].set(x)
    for layer, bn in zip(params["layers"][:-1], params["bns"]):
        h = gat_conv_bn_relu(h, adj_p, layer, bn, tile_m, tile_n)   # GATConv+flatten+BN+ReLU
    return gat_pool_classify(h, adj_p, pool_t, params["layers"][-1],   # GATConv+pool+classifier
                             params["cls_w"], params["cls_b"], tile_m, tile_n)


# ---------------------------------------------------------------------------
if __name__ == "__main__":
    key = jax.random.PRNGKey(0)
    k_x, k_p = jax.random.split(key)

    B = 2                      # graphs in the batch
    NODES_PER_GRAPH = 72       # N=144 -> padded to 256 with tile_n=128 (2 source chunks)
    N = B * NODES_PER_GRAPH
    in_feats, hidden_dim, out_dim = 8, 8, 3
    num_layers, num_heads = 3, 4

    # batched graph = block-diagonal adjacency: bidirectional ring per graph + self loops
    adj_np = np.zeros((N, N), dtype=np.float32)      # adj[dst, src]
    pool_np = np.zeros((B, N), dtype=np.float32)     # graph membership (SumPooling)
    for g in range(B):
        off = g * NODES_PER_GRAPH
        pool_np[g, off:off + NODES_PER_GRAPH] = 1.0
        for i in range(NODES_PER_GRAPH):
            s = off + i
            d = off + (i + 1) % NODES_PER_GRAPH
            adj_np[d, s] = 1.0
            adj_np[s, d] = 1.0
            adj_np[s, s] = 1.0
    adj = jnp.asarray(adj_np)
    pool = jnp.asarray(pool_np)

    x = jax.random.normal(k_x, (N, in_feats), jnp.float32)
    params = init_gat_classifier(k_p, in_feats, hidden_dim, out_dim, num_layers, num_heads)

    # tile_m=8, tile_n=128 -> 32 destination tiles x 2 source chunks per layer,
    # exercising both grid axes, the scratch reuse and the chunked accumulation.
    logits = jax.block_until_ready(
        gat_classifier_forward(params, adj, pool, x, tile_m=8, tile_n=128))
    assert logits.shape == (B, out_dim), logits.shape
    assert bool(jnp.all(jnp.isfinite(logits)))
    print("KERNEL_OK")
</pallas_src>

<mosaic_0001>
module attributes {stable_mosaic.version = 11 : i64} {
  func.func @_gat_bn_relu_kernel(%arg0: i32, %arg1: i32, %arg2: memref<256x8xf32, #tpu.memory_space<vmem>>, %arg3: memref<8x32xf32, #tpu.memory_space<vmem>>, %arg4: memref<32x4xf32, #tpu.memory_space<vmem>>, %arg5: memref<32x4xf32, #tpu.memory_space<vmem>>, %arg6: memref<8x128xbf16, #tpu.memory_space<vmem>>, %arg7: memref<1x32xf32, #tpu.memory_space<vmem>>, %arg8: memref<1x32xf32, #tpu.memory_space<vmem>>, %arg9: memref<8x32xbf16, #tpu.memory_space<vmem>>, %arg10: memref<2x512x36xbf16, #tpu.memory_space<vmem>>, %arg11: memref<2x4x128xf32, #tpu.memory_space<vmem>>, %arg12: memref<256x4xf32, #tpu.memory_space<vmem>>, %arg13: memref<1x4xf32, #tpu.memory_space<vmem>>, %arg14: memref<8x36xf32, #tpu.memory_space<vmem>>) attributes {dimension_semantics = [#tpu.dimension_semantics<arbitrary>, #tpu.dimension_semantics<arbitrary>], iteration_bounds = array<i64: 32, 2>, scalar_prefetch = 0 : i64, scratch_operands = 5 : i64, tpu.core_type = #tpu.core_type<tc>, window_params = [{pipeline_mode = #tpu.pipeline_mode<synchronous>, transform_indices = @transform_0, window_bounds = array<i64: 256, 8>}, {pipeline_mode = #tpu.pipeline_mode<synchronous>, transform_indices = @transform_1, window_bounds = array<i64: 8, 32>}, {pipeline_mode = #tpu.pipeline_mode<synchronous>, transform_indices = @transform_2, window_bounds = array<i64: 32, 4>}, {pipeline_mode = #tpu.pipeline_mode<synchronous>, transform_indices = @transform_3, window_bounds = array<i64: 32, 4>}, {transform_indices = @transform_4, window_bounds = array<i64: 8, 128>}, {pipeline_mode = #tpu.pipeline_mode<synchronous>, transform_indices = @transform_5, window_bounds = array<i64: 1, 32>}, {pipeline_mode = #tpu.pipeline_mode<synchronous>, transform_indices = @transform_6, window_bounds = array<i64: 1, 32>}, {transform_indices = @transform_7, window_bounds = array<i64: 8, 32>}]} {
    %c0_i32 = arith.constant 0 : i32
    %0 = arith.cmpi eq, %arg0, %c0_i32 : i32
    %c0_i32_0 = arith.constant 0 : i32
    %1 = arith.cmpi eq, %arg1, %c0_i32_0 : i32
    %2 = arith.andi %0, %1 : i1
    %3 = arith.extui %2 : i1 to i32
    %c0_i32_1 = arith.constant 0 : i32
    %4 = arith.cmpi ne, %3, %c0_i32_1 : i32
    scf.if %4 {
      %c0_22 = arith.constant 0 : index
      %c0_23 = arith.constant 0 : index
      %87 = vector.load %arg2[%c0_22, %c0_23] : memref<256x8xf32, #tpu.memory_space<vmem>>, vector<256x8xf32>
      %88 = arith.truncf %87 : vector<256x8xf32> to vector<256x8xbf16>
      %c0_24 = arith.constant 0 : index
      %c0_25 = arith.constant 0 : index
      %89 = vector.load %arg3[%c0_24, %c0_25] : memref<8x32xf32, #tpu.memory_space<vmem>>, vector<8x32xf32>
      %90 = arith.truncf %89 : vector<8x32xf32> to vector<8x32xbf16>
      %cst_26 = arith.constant dense<0.000000e+00> : vector<256x32xf32>
      %91 = tpu.matmul %88, %90, %cst_26 {dimension_numbers = #tpu.dot_dimension_numbers<[1], [0], [0], [1], [0, 0, 1, 1], [], []>} : vector<256x8xbf16>, vector<8x32xbf16>, vector<256x32xf32> -> vector<256x32xf32>
      %c0_27 = arith.constant 0 : index
      %c0_28 = arith.constant 0 : index
      %92 = vector.load %arg4[%c0_27, %c0_28] : memref<32x4xf32, #tpu.memory_space<vmem>>, vector<32x4xf32>
      %cst_29 = arith.constant dense<0.000000e+00> : vector<256x4xf32>
      %93 = tpu.matmul %91, %92, %cst_29 {dimension_numbers = #tpu.dot_dimension_numbers<[1], [0], [0], [1], [0, 0, 1, 1], [], []>} : vector<256x32xf32>, vector<32x4xf32>, vector<256x4xf32> -> vector<256x4xf32>
      %c0_30 = arith.constant 0 : index
      %c0_31 = arith.constant 0 : index
      %94 = vector.load %arg5[%c0_30, %c0_31] : memref<32x4xf32, #tpu.memory_space<vmem>>, vector<32x4xf32>
      %cst_32 = arith.constant dense<0.000000e+00> : vector<256x4xf32>
      %95 = tpu.matmul %91, %94, %cst_32 {dimension_numbers = #tpu.dot_dimension_numbers<[1], [0], [0], [1], [0, 0, 1, 1], [], []>} : vector<256x32xf32>, vector<32x4xf32>, vector<256x4xf32> -> vector<256x4xf32>
      %c0_33 = arith.constant 0 : index
      %c0_34 = arith.constant 0 : index
      %96 = vector.load %arg12[%c0_33, %c0_34] : memref<256x4xf32, #tpu.memory_space<vmem>>, vector<256x4xf32>
      tpu.vector_store %arg12[%c0_33, %c0_34], %95 {strides = array<i32>} : memref<256x4xf32, #tpu.memory_space<vmem>>, vector<256x4xf32>,
      %cst_35 = arith.constant dense<0xFF800000> : vector<4xf32>
      %97 = vector.multi_reduction <maximumf>, %93, %cst_35 [0] : vector<256x4xf32> to vector<4xf32>
      %98 = vector.shape_cast %97 : vector<4xf32> to vector<1x4xf32>
      %c0_36 = arith.constant 0 : index
      %c0_37 = arith.constant 0 : index
      %99 = vector.load %arg13[%c0_36, %c0_37] : memref<1x4xf32, #tpu.memory_space<vmem>>, vector<1x4xf32>
      tpu.vector_store %arg13[%c0_36, %c0_37], %98 {strides = array<i32>} : memref<1x4xf32, #tpu.memory_space<vmem>>, vector<1x4xf32>,
      %100 = tpu.transpose %93, [1, 0] : vector<256x4xf32> -> vector<4x256xf32>
      %101 = vector.extract_strided_slice %100 {offsets = [0, 0], sizes = [4, 128], strides = [1, 1]} : vector<4x256xf32> to vector<4x128xf32>
      %c0_38 = arith.constant 0 : index
      %c0_39 = arith.constant 0 : index
      %c0_40 = arith.constant 0 : index
      %102 = vector.load %arg11[%c0_38, %c0_39, %c0_40] : memref<2x4x128xf32, #tpu.memory_space<vmem>>, vector<1x4x128xf32>
      %103 = vector.shape_cast %102 : vector<1x4x128xf32> to vector<4x128xf32>
      %104 = vector.shape_cast %101 : vector<4x128xf32> to vector<1x4x128xf32>
      tpu.vector_store %arg11[%c0_38, %c0_39, %c0_40], %104 {strides = array<i32>} : memref<2x4x128xf32, #tpu.memory_space<vmem>>, vector<1x4x128xf32>,
      %105 = vector.extract_strided_slice %91 {offsets = [0, 0], sizes = [128, 8], strides = [1, 1]} : vector<256x32xf32> to vector<128x8xf32>
      %106 = tpu.iota {dimensions = array<i32: 1>} : vector<128x4xi32>
      %c0_i32_41 = arith.constant 0 : i32
      %107 = vector.broadcast %c0_i32_41 : i32 to vector<128x4xi32>
      %108 = arith.cmpi eq, %106, %107 : vector<128x4xi32>
      %109 = arith.extui %108 : vector<128x4xi1> to vector<128x4xi32>
      %110 = arith.sitofp %109 : vector<128x4xi32> to vector<128x4xf32>
      %cst_42 = arith.constant 0.000000e+00 : f32
      %111 = vector.broadcast %cst_42 : f32 to vector<128x24xf32>
      %112 = tpu.concatenate %105, %111, %110 in 1 : vector<128x8xf32>, vector<128x24xf32>, vector<128x4xf32> -> vector<128x36xf32>
      %113 = arith.truncf %112 : vector<128x36xf32> to vector<128x36xbf16>
      %c0_43 = arith.constant 0 : index
      %c0_44 = arith.constant 0 : index
      %c0_45 = arith.constant 0 : index
      %114 = vector.load %arg10[%c0_43, %c0_44, %c0_45] : memref<2x512x36xbf16, #tpu.memory_space<vmem>>, vector<1x128x36xbf16>
      %115 = vector.shape_cast %114 : vector<1x128x36xbf16> to vector<128x36xbf16>
      %116 = vector.shape_cast %113 : vector<128x36xbf16> to vector<1x128x36xbf16>
      tpu.vector_store %arg10[%c0_43, %c0_44, %c0_45], %116 {strides = array<i32>} : memref<2x512x36xbf16, #tpu.memory_space<vmem>>, vector<1x128x36xbf16>,
      %117 = vector.extract_strided_slice %91 {offsets = [0, 8], sizes = [128, 8], strides = [1, 1]} : vector<256x32xf32> to vector<128x8xf32>
      %118 = tpu.iota {dimensions = array<i32: 1>} : vector<128x4xi32>
      %c1_i32_46 = arith.constant 1 : i32
      %119 = vector.broadcast %c1_i32_46 : i32 to vector<128x4xi32>
      %120 = arith.cmpi eq, %118, %119 : vector<128x4xi32>
      %121 = arith.extui %120 : vector<128x4xi1> to vector<128x4xi32>
      %122 = arith.sitofp %121 : vector<128x4xi32> to vector<128x4xf32>
      %cst_47 = arith.constant 0.000000e+00 : f32
      %123 = vector.broadcast %cst_47 : f32 to vector<128x8xf32>
      %cst_48 = arith.constant 0.000000e+00 : f32
      %124 = vector.broadcast %cst_48 : f32 to vector<128x16xf32>
      %125 = tpu.concatenate %123, %117, %124, %122 in 1 : vector<128x8xf32>, vector<128x8xf32>, vector<128x16xf32>, vector<128x4xf32> -> vector<128x36xf32>
      %126 = arith.truncf %125 : vector<128x36xf32> to vector<128x36xbf16>
      %c0_49 = arith.constant 0 : index
      %c128 = arith.constant 128 : index
      %c0_50 = arith.constant 0 : index
      %127 = vector.load %arg10[%c0_49, %c128, %c0_50] : memref<2x512x36xbf16, #tpu.memory_space<vmem>>, vector<1x128x36xbf16>
      %128 = vector.shape_cast %127 : vector<1x128x36xbf16> to vector<128x36xbf16>
      %129 = vector.shape_cast %126 : vector<128x36xbf16> to vector<1x128x36xbf16>
      tpu.vector_store %arg10[%c0_49, %c128, %c0_50], %129 {strides = array<i32>} : memref<2x512x36xbf16, #tpu.memory_space<vmem>>, vector<1x128x36xbf16>,
      %130 = vector.extract_strided_slice %91 {offsets = [0, 16], sizes = [128, 8], strides = [1, 1]} : vector<256x32xf32> to vector<128x8xf32>
      %131 = tpu.iota {dimensions = array<i32: 1>} : vector<128x4xi32>
      %c2_i32 = arith.constant 2 : i32
      %132 = vector.broadcast %c2_i32 : i32 to vector<128x4xi32>
      %133 = arith.cmpi eq, %131, %132 : vector<128x4xi32>
      %134 = arith.extui %133 : vector<128x4xi1> to vector<128x4xi32>
      %135 = arith.sitofp %134 : vector<128x4xi32> to vector<128x4xf32>
      %cst_51 = arith.constant 0.000000e+00 : f32
      %136 = vector.broadcast %cst_51 : f32 to vector<128x16xf32>
      %cst_52 = arith.constant 0.000000e+00 : f32
      %137 = vector.broadcast %cst_52 : f32 to vector<128x8xf32>
      %138 = tpu.concatenate %136, %130, %137, %135 in 1 : vector<128x16xf32>, vector<128x8xf32>, vector<128x8xf32>, vector<128x4xf32> -> vector<128x36xf32>
      %139 = arith.truncf %138 : vector<128x36xf32> to vector<128x36xbf16>
      %c0_53 = arith.constant 0 : index
      %c256 = arith.constant 256 : index
      %c0_54 = arith.constant 0 : index
      %140 = vector.load %arg10[%c0_53, %c256, %c0_54] : memref<2x512x36xbf16, #tpu.memory_space<vmem>>, vector<1x128x36xbf16>
      %141 = vector.shape_cast %140 : vector<1x128x36xbf16> to vector<128x36xbf16>
      %142 = vector.shape_cast %139 : vector<128x36xbf16> to vector<1x128x36xbf16>
      tpu.vector_store %arg10[%c0_53, %c256, %c0_54], %142 {strides = array<i32>} : memref<2x512x36xbf16, #tpu.memory_space<vmem>>, vector<1x128x36xbf16>,
      %143 = vector.extract_strided_slice %91 {offsets = [0, 24], sizes = [128, 8], strides = [1, 1]} : vector<256x32xf32> to vector<128x8xf32>
      %144 = tpu.iota {dimensions = array<i32: 1>} : vector<128x4xi32>
      %c3_i32 = arith.constant 3 : i32
      %145 = vector.broadcast %c3_i32 : i32 to vector<128x4xi32>
      %146 = arith.cmpi eq, %144, %145 : vector<128x4xi32>
      %147 = arith.extui %146 : vector<128x4xi1> to vector<128x4xi32>
      %148 = arith.sitofp %147 : vector<128x4xi32> to vector<128x4xf32>
      %cst_55 = arith.constant 0.000000e+00 : f32
      %149 = vector.broadcast %cst_55 : f32 to vector<128x24xf32>
      %150 = tpu.concatenate %149, %143, %148 in 1 : vector<128x24xf32>, vector<128x8xf32>, vector<128x4xf32> -> vector<128x36xf32>
      %151 = arith.truncf %150 : vector<128x36xf32> to vector<128x36xbf16>
      %c0_56 = arith.constant 0 : index
      %c384 = arith.constant 384 : index
      %c0_57 = arith.constant 0 : index
      %152 = vector.load %arg10[%c0_56, %c384, %c0_57] : memref<2x512x36xbf16, #tpu.memory_space<vmem>>, vector<1x128x36xbf16>
      %153 = vector.shape_cast %152 : vector<1x128x36xbf16> to vector<128x36xbf16>
      %154 = vector.shape_cast %151 : vector<128x36xbf16> to vector<1x128x36xbf16>
      tpu.vector_store %arg10[%c0_56, %c384, %c0_57], %154 {strides = array<i32>} : memref<2x512x36xbf16, #tpu.memory_space<vmem>>, vector<1x128x36xbf16>,
      %155 = vector.extract_strided_slice %100 {offsets = [0, 128], sizes = [4, 128], strides = [1, 1]} : vector<4x256xf32> to vector<4x128xf32>
      %c1 = arith.constant 1 : index
      %c0_58 = arith.constant 0 : index
      %c0_59 = arith.constant 0 : index
      %156 = vector.load %arg11[%c1, %c0_58, %c0_59] : memref<2x4x128xf32, #tpu.memory_space<vmem>>, vector<1x4x128xf32>
      %157 = vector.shape_cast %156 : vector<1x4x128xf32> to vector<4x128xf32>
      %158 = vector.shape_cast %155 : vector<4x128xf32> to vector<1x4x128xf32>
      tpu.vector_store %arg11[%c1, %c0_58, %c0_59], %158 {strides = array<i32>} : memref<2x4x128xf32, #tpu.memory_space<vmem>>, vector<1x4x128xf32>,
      %159 = vector.extract_strided_slice %91 {offsets = [128, 0], sizes = [128, 8], strides = [1, 1]} : vector<256x32xf32> to vector<128x8xf32>
      %160 = tpu.iota {dimensions = array<i32: 1>} : vector<128x4xi32>
      %c0_i32_60 = arith.constant 0 : i32
      %161 = vector.broadcast %c0_i32_60 : i32 to vector<128x4xi32>
      %162 = arith.cmpi eq, %160, %161 : vector<128x4xi32>
      %163 = arith.extui %162 : vector<128x4xi1> to vector<128x4xi32>
      %164 = arith.sitofp %163 : vector<128x4xi32> to vector<128x4xf32>
      %cst_61 = arith.constant 0.000000e+00 : f32
      %165 = vector.broadcast %cst_61 : f32 to vector<128x24xf32>
      %166 = tpu.concatenate %159, %165, %164 in 1 : vector<128x8xf32>, vector<128x24xf32>, vector<128x4xf32> -> vector<128x36xf32>
      %167 = arith.truncf %166 : vector<128x36xf32> to vector<128x36xbf16>
      %c1_62 = arith.constant 1 : index
      %c0_63 = arith.constant 0 : index
      %c0_64 = arith.constant 0 : index
      %168 = vector.load %arg10[%c1_62, %c0_63, %c0_64] : memref<2x512x36xbf16, #tpu.memory_space<vmem>>, vector<1x128x36xbf16>
      %169 = vector.shape_cast %168 : vector<1x128x36xbf16> to vector<128x36xbf16>
      %170 = vector.shape_cast %167 : vector<128x36xbf16> to vector<1x128x36xbf16>
      tpu.vector_store %arg10[%c1_62, %c0_63, %c0_64], %170 {strides = array<i32>} : memref<2x512x36xbf16, #tpu.memory_space<vmem>>, vector<1x128x36xbf16>,
      %171 = vector.extract_strided_slice %91 {offsets = [128, 8], sizes = [128, 8], strides = [1, 1]} : vector<256x32xf32> to vector<128x8xf32>
      %172 = tpu.iota {dimensions = array<i32: 1>} : vector<128x4xi32>
      %c1_i32_65 = arith.constant 1 : i32
      %173 = vector.broadcast %c1_i32_65 : i32 to vector<128x4xi32>
      %174 = arith.cmpi eq, %172, %173 : vector<128x4xi32>
      %175 = arith.extui %174 : vector<128x4xi1> to vector<128x4xi32>
      %176 = arith.sitofp %175 : vector<128x4xi32> to vector<128x4xf32>
      %cst_66 = arith.constant 0.000000e+00 : f32
      %177 = vector.broadcast %cst_66 : f32 to vector<128x8xf32>
      %cst_67 = arith.constant 0.000000e+00 : f32
      %178 = vector.broadcast %cst_67 : f32 to vector<128x16xf32>
      %179 = tpu.concatenate %177, %171, %178, %176 in 1 : vector<128x8xf32>, vector<128x8xf32>, vector<128x16xf32>, vector<128x4xf32> -> vector<128x36xf32>
      %180 = arith.truncf %179 : vector<128x36xf32> to vector<128x36xbf16>
      %c1_68 = arith.constant 1 : index
      %c128_69 = arith.constant 128 : index
      %c0_70 = arith.constant 0 : index
      %181 = vector.load %arg10[%c1_68, %c128_69, %c0_70] : memref<2x512x36xbf16, #tpu.memory_space<vmem>>, vector<1x128x36xbf16>
      %182 = vector.shape_cast %181 : vector<1x128x36xbf16> to vector<128x36xbf16>
      %183 = vector.shape_cast %180 : vector<128x36xbf16> to vector<1x128x36xbf16>
      tpu.vector_store %arg10[%c1_68, %c128_69, %c0_70], %183 {strides = array<i32>} : memref<2x512x36xbf16, #tpu.memory_space<vmem>>, vector<1x128x36xbf16>,
      %184 = vector.extract_strided_slice %91 {offsets = [128, 16], sizes = [128, 8], strides = [1, 1]} : vector<256x32xf32> to vector<128x8xf32>
      %185 = tpu.iota {dimensions = array<i32: 1>} : vector<128x4xi32>
      %c2_i32_71 = arith.constant 2 : i32
      %186 = vector.broadcast %c2_i32_71 : i32 to vector<128x4xi32>
      %187 = arith.cmpi eq, %185, %186 : vector<128x4xi32>
      %188 = arith.extui %187 : vector<128x4xi1> to vector<128x4xi32>
      %189 = arith.sitofp %188 : vector<128x4xi32> to vector<128x4xf32>
      %cst_72 = arith.constant 0.000000e+00 : f32
      %190 = vector.broadcast %cst_72 : f32 to vector<128x16xf32>
      %cst_73 = arith.constant 0.000000e+00 : f32
      %191 = vector.broadcast %cst_73 : f32 to vector<128x8xf32>
      %192 = tpu.concatenate %190, %184, %191, %189 in 1 : vector<128x16xf32>, vector<128x8xf32>, vector<128x8xf32>, vector<128x4xf32> -> vector<128x36xf32>
      %193 = arith.truncf %192 : vector<128x36xf32> to vector<128x36xbf16>
      %c1_74 = arith.constant 1 : index
      %c256_75 = arith.constant 256 : index
      %c0_76 = arith.constant 0 : index
      %194 = vector.load %arg10[%c1_74, %c256_75, %c0_76] : memref<2x512x36xbf16, #tpu.memory_space<vmem>>, vector<1x128x36xbf16>
      %195 = vector.shape_cast %194 : vector<1x128x36xbf16> to vector<128x36xbf16>
      %196 = vector.shape_cast %193 : vector<128x36xbf16> to vector<1x128x36xbf16>
      tpu.vector_store %arg10[%c1_74, %c256_75, %c0_76], %196 {strides = array<i32>} : memref<2x512x36xbf16, #tpu.memory_space<vmem>>, vector<1x128x36xbf16>,
      %197 = vector.extract_strided_slice %91 {offsets = [128, 24], sizes = [128, 8], strides = [1, 1]} : vector<256x32xf32> to vector<128x8xf32>
      %198 = tpu.iota {dimensions = array<i32: 1>} : vector<128x4xi32>
      %c3_i32_77 = arith.constant 3 : i32
      %199 = vector.broadcast %c3_i32_77 : i32 to vector<128x4xi32>
      %200 = arith.cmpi eq, %198, %199 : vector<128x4xi32>
      %201 = arith.extui %200 : vector<128x4xi1> to vector<128x4xi32>
      %202 = arith.sitofp %201 : vector<128x4xi32> to vector<128x4xf32>
      %cst_78 = arith.constant 0.000000e+00 : f32
      %203 = vector.broadcast %cst_78 : f32 to vector<128x24xf32>
      %204 = tpu.concatenate %203, %197, %202 in 1 : vector<128x24xf32>, vector<128x8xf32>, vector<128x4xf32> -> vector<128x36xf32>
      %205 = arith.truncf %204 : vector<128x36xf32> to vector<128x36xbf16>
      %c1_79 = arith.constant 1 : index
      %c384_80 = arith.constant 384 : index
      %c0_81 = arith.constant 0 : index
      %206 = vector.load %arg10[%c1_79, %c384_80, %c0_81] : memref<2x512x36xbf16, #tpu.memory_space<vmem>>, vector<1x128x36xbf16>
      %207 = vector.shape_cast %206 : vector<1x128x36xbf16> to vector<128x36xbf16>
      %208 = vector.shape_cast %205 : vector<128x36xbf16> to vector<1x128x36xbf16>
      tpu.vector_store %arg10[%c1_79, %c384_80, %c0_81], %208 {strides = array<i32>} : memref<2x512x36xbf16, #tpu.memory_space<vmem>>, vector<1x128x36xbf16>,
    } else {
    }
    %c0_i32_2 = arith.constant 0 : i32
    %5 = arith.cmpi eq, %arg1, %c0_i32_2 : i32
    %6 = arith.extui %5 : i1 to i32
    %c0_i32_3 = arith.constant 0 : i32
    %7 = arith.cmpi ne, %6, %c0_i32_3 : i32
    scf.if %7 {
      %cst_22 = arith.constant 0.000000e+00 : f32
      %87 = vector.broadcast %cst_22 : f32 to vector<8x36xf32>
      %c0_23 = arith.constant 0 : index
      %c0_24 = arith.constant 0 : index
      %88 = vector.load %arg14[%c0_23, %c0_24] : memref<8x36xf32, #tpu.memory_space<vmem>>, vector<8x36xf32>
      tpu.vector_store %arg14[%c0_23, %c0_24], %87 {strides = array<i32>} : memref<8x36xf32, #tpu.memory_space<vmem>>, vector<8x36xf32>,
    } else {
    }
    %c8_i32 = arith.constant 8 : i32
    %8 = arith.muli %arg0, %c8_i32 : i32
    %9 = tpu.assume_multiple %8, 8 : i32
    %c0 = arith.constant 0 : index
    %c0_4 = arith.constant 0 : index
    %10 = vector.load %arg6[%c0, %c0_4] : memref<8x128xbf16, #tpu.memory_space<vmem>>, vector<8x128xbf16>
    %11 = arith.extf %10 : vector<8x128xbf16> to vector<8x128xf32>
    %12 = arith.index_cast %9 : i32 to index
    %c0_5 = arith.constant 0 : index
    %13 = vector.load %arg12[%12, %c0_5] : memref<256x4xf32, #tpu.memory_space<vmem>>, vector<8x4xf32>
    %c0_6 = arith.constant 0 : index
    %c0_7 = arith.constant 0 : index
    %14 = vector.load %arg13[%c0_6, %c0_7] : memref<1x4xf32, #tpu.memory_space<vmem>>, vector<1x4xf32>
    %15 = vector.broadcast %14 : vector<1x4xf32> to vector<8x4xf32>
    %16 = arith.addf %13, %15 : vector<8x4xf32>
    %cst = arith.constant 2.000000e-01 : f32
    %17 = vector.broadcast %cst : f32 to vector<8x4xf32>
    %18 = arith.mulf %17, %16 : vector<8x4xf32>
    %19 = arith.maximumf %16, %18 : vector<8x4xf32>
    %20 = arith.index_cast %arg1 : i32 to index
    %c0_8 = arith.constant 0 : index
    %c0_9 = arith.constant 0 : index
    %21 = vector.load %arg11[%20, %c0_8, %c0_9] : memref<2x4x128xf32, #tpu.memory_space<vmem>>, vector<1x4x128xf32>
    %22 = vector.shape_cast %21 : vector<1x4x128xf32> to vector<4x128xf32>
    %23 = vector.extract_strided_slice %13 {offsets = [0, 0], sizes = [8, 1], strides = [1, 1]} : vector<8x4xf32> to vector<8x1xf32>
    %24 = vector.extract_strided_slice %22 {offsets = [0, 0], sizes = [1, 128], strides = [1, 1]} : vector<4x128xf32> to vector<1x128xf32>
    %25 = vector.broadcast %23 : vector<8x1xf32> to vector<8x128xf32>
    %26 = vector.broadcast %24 : vector<1x128xf32> to vector<8x128xf32>
    %27 = arith.addf %25, %26 : vector<8x128xf32>
    %cst_10 = arith.constant 2.000000e-01 : f32
    %28 = vector.broadcast %cst_10 : f32 to vector<8x128xf32>
    %29 = arith.mulf %28, %27 : vector<8x128xf32>
    %30 = arith.maximumf %27, %29 : vector<8x128xf32>
    %31 = vector.extract_strided_slice %19 {offsets = [0, 0], sizes = [8, 1], strides = [1, 1]} : vector<8x4xf32> to vector<8x1xf32>
    %32 = vector.broadcast %31 : vector<8x1xf32> to vector<8x128xf32>
    %33 = arith.subf %30, %32 : vector<8x128xf32>
    %34 = math.exp %33 : vector<8x128xf32>
    %35 = arith.mulf %34, %11 : vector<8x128xf32>
    %36 = vector.extract_strided_slice %13 {offsets = [0, 1], sizes = [8, 1], strides = [1, 1]} : vector<8x4xf32> to vector<8x1xf32>
    %37 = vector.extract_strided_slice %22 {offsets = [1, 0], sizes = [1, 128], strides = [1, 1]} : vector<4x128xf32> to vector<1x128xf32>
    %38 = vector.broadcast %36 : vector<8x1xf32> to vector<8x128xf32>
    %39 = vector.broadcast %37 : vector<1x128xf32> to vector<8x128xf32>
    %40 = arith.addf %38, %39 : vector<8x128xf32>
    %cst_11 = arith.constant 2.000000e-01 : f32
    %41 = vector.broadcast %cst_11 : f32 to vector<8x128xf32>
    %42 = arith.mulf %41, %40 : vector<8x128xf32>
    %43 = arith.maximumf %40, %42 : vector<8x128xf32>
    %44 = vector.extract_strided_slice %19 {offsets = [0, 1], sizes = [8, 1], strides = [1, 1]} : vector<8x4xf32> to vector<8x1xf32>
    %45 = vector.broadcast %44 : vector<8x1xf32> to vector<8x128xf32>
    %46 = arith.subf %43, %45 : vector<8x128xf32>
    %47 = math.exp %46 : vector<8x128xf32>
    %48 = arith.mulf %47, %11 : vector<8x128xf32>
    %49 = vector.extract_strided_slice %13 {offsets = [0, 2], sizes = [8, 1], strides = [1, 1]} : vector<8x4xf32> to vector<8x1xf32>
    %50 = vector.extract_strided_slice %22 {offsets = [2, 0], sizes = [1, 128], strides = [1, 1]} : vector<4x128xf32> to vector<1x128xf32>
    %51 = vector.broadcast %49 : vector<8x1xf32> to vector<8x128xf32>
    %52 = vector.broadcast %50 : vector<1x128xf32> to vector<8x128xf32>
    %53 = arith.addf %51, %52 : vector<8x128xf32>
    %cst_12 = arith.constant 2.000000e-01 : f32
    %54 = vector.broadcast %cst_12 : f32 to vector<8x128xf32>
    %55 = arith.mulf %54, %53 : vector<8x128xf32>
    %56 = arith.maximumf %53, %55 : vector<8x128xf32>
    %57 = vector.extract_strided_slice %19 {offsets = [0, 2], sizes = [8, 1], strides = [1, 1]} : vector<8x4xf32> to vector<8x1xf32>
    %58 = vector.broadcast %57 : vector<8x1xf32> to vector<8x128xf32>
    %59 = arith.subf %56, %58 : vector<8x128xf32>
    %60 = math.exp %59 : vector<8x128xf32>
    %61 = arith.mulf %60, %11 : vector<8x128xf32>
    %62 = vector.extract_strided_slice %13 {offsets = [0, 3], sizes = [8, 1], strides = [1, 1]} : vector<8x4xf32> to vector<8x1xf32>
    %63 = vector.extract_strided_slice %22 {offsets = [3, 0], sizes = [1, 128], strides = [1, 1]} : vector<4x128xf32> to vector<1x128xf32>
    %64 = vector.broadcast %62 : vector<8x1xf32> to vector<8x128xf32>
    %65 = vector.broadcast %63 : vector<1x128xf32> to vector<8x128xf32>
    %66 = arith.addf %64, %65 : vector<8x128xf32>
    %cst_13 = arith.constant 2.000000e-01 : f32
    %67 = vector.broadcast %cst_13 : f32 to vector<8x128xf32>
    %68 = arith.mulf %67, %66 : vector<8x128xf32>
    %69 = arith.maximumf %66, %68 : vector<8x128xf32>
    %70 = vector.extract_strided_slice %19 {offsets = [0, 3], sizes = [8, 1], strides = [1, 1]} : vector<8x4xf32> to vector<8x1xf32>
    %71 = vector.broadcast %70 : vector<8x1xf32> to vector<8x128xf32>
    %72 = arith.subf %69, %71 : vector<8x128xf32>
    %73 = math.exp %72 : vector<8x128xf32>
    %74 = arith.mulf %73, %11 : vector<8x128xf32>
    %75 = tpu.concatenate %35, %48, %61, %74 in 1 : vector<8x128xf32>, vector<8x128xf32>, vector<8x128xf32>, vector<8x128xf32> -> vector<8x512xf32>
    %c0_14 = arith.constant 0 : index
    %c0_15 = arith.constant 0 : index
    %76 = vector.load %arg14[%c0_14, %c0_15] : memref<8x36xf32, #tpu.memory_space<vmem>>, vector<8x36xf32>
    %77 = arith.truncf %75 : vector<8x512xf32> to vector<8x512xbf16>
    %78 = arith.index_cast %arg1 : i32 to index
    %c0_16 = arith.constant 0 : index
    %c0_17 = arith.constant 0 : index
    %79 = vector.load %arg10[%78, %c0_16, %c0_17] : memref<2x512x36xbf16, #tpu.memory_space<vmem>>, vector<1x512x36xbf16>
    %80 = vector.shape_cast %79 : vector<1x512x36xbf16> to vector<512x36xbf16>
    %cst_18 = arith.constant dense<0.000000e+00> : vector<8x36xf32>
    %81 = tpu.matmul %77, %80, %cst_18 {dimension_numbers = #tpu.dot_dimension_numbers<[1], [0], [0], [1], [0, 0, 1, 1], [], []>} : vector<8x512xbf16>, vector<512x36xbf16>, vector<8x36xf32> -> vector<8x36xf32>
    %82 = arith.addf %76, %81 : vector<8x36xf32>
    %c0_19 = arith.constant 0 : index
    %c0_20 = arith.constant 0 : index
    %83 = vector.load %arg14[%c0_19, %c0_20] : memref<8x36xf32, #tpu.memory_space<vmem>>, vector<8x36xf32>
    tpu.vector_store %arg14[%c0_19, %c0_20], %82 {strides = array<i32>} : memref<8x36xf32, #tpu.memory_space<vmem>>, vector<8x36xf32>,
    %c1_i32 = arith.constant 1 : i32
    %84 = arith.cmpi eq, %arg1, %c1_i32 : i32
    %85 = arith.extui %84 : i1 to i32
    %c0_i32_21 = arith.constant 0 : i32
    %86 = arith.cmpi ne, %85, %c0_i32_21 : i32
    scf.if %86 {
      %c0_22 = arith.constant 0 : index
      %c0_23 = arith.constant 0 : index
      %87 = vector.load %arg14[%c0_22, %c0_23] : memref<8x36xf32, #tpu.memory_space<vmem>>, vector<8x36xf32>
      %88 = vector.extract_strided_slice %87 {offsets = [0, 32], sizes = [8, 1], strides = [1, 1]} : vector<8x36xf32> to vector<8x1xf32>
      %cst_24 = arith.constant 9.99999971E-10 : f32
      %89 = vector.broadcast %cst_24 : f32 to vector<8x1xf32>
      %90 = arith.maximumf %88, %89 : vector<8x1xf32>
      %91 = tpu.reciprocal %90 {approx = true} : vector<8x1xf32> -> vector<8x1xf32>
      %92 = vector.extract_strided_slice %87 {offsets = [0, 0], sizes = [8, 8], strides = [1, 1]} : vector<8x36xf32> to vector<8x8xf32>
      %93 = vector.broadcast %91 : vector<8x1xf32> to vector<8x8xf32>
      %94 = arith.mulf %92, %93 : vector<8x8xf32>
      %95 = vector.extract_strided_slice %87 {offsets = [0, 33], sizes = [8, 1], strides = [1, 1]} : vector<8x36xf32> to vector<8x1xf32>
      %cst_25 = arith.constant 9.99999971E-10 : f32
      %96 = vector.broadcast %cst_25 : f32 to vector<8x1xf32>
      %97 = arith.maximumf %95, %96 : vector<8x1xf32>
      %98 = tpu.reciprocal %97 {approx = true} : vector<8x1xf32> -> vector<8x1xf32>
      %99 = vector.extract_strided_slice %87 {offsets = [0, 8], sizes = [8, 8], strides = [1, 1]} : vector<8x36xf32> to vector<8x8xf32>
      %100 = vector.broadcast %98 : vector<8x1xf32> to vector<8x8xf32>
      %101 = arith.mulf %99, %100 : vector<8x8xf32>
      %102 = vector.extract_strided_slice %87 {offsets = [0, 34], sizes = [8, 1], strides = [1, 1]} : vector<8x36xf32> to vector<8x1xf32>
      %cst_26 = arith.constant 9.99999971E-10 : f32
      %103 = vector.broadcast %cst_26 : f32 to vector<8x1xf32>
      %104 = arith.maximumf %102, %103 : vector<8x1xf32>
      %105 = tpu.reciprocal %104 {approx = true} : vector<8x1xf32> -> vector<8x1xf32>
      %106 = vector.extract_strided_slice %87 {offsets = [0, 16], sizes = [8, 8], strides = [1, 1]} : vector<8x36xf32> to vector<8x8xf32>
      %107 = vector.broadcast %105 : vector<8x1xf32> to vector<8x8xf32>
      %108 = arith.mulf %106, %107 : vector<8x8xf32>
      %109 = vector.extract_strided_slice %87 {offsets = [0, 35], sizes = [8, 1], strides = [1, 1]} : vector<8x36xf32> to vector<8x1xf32>
      %cst_27 = arith.constant 9.99999971E-10 : f32
      %110 = vector.broadcast %cst_27 : f32 to vector<8x1xf32>
      %111 = arith.maximumf %109, %110 : vector<8x1xf32>
      %112 = tpu.reciprocal %111 {approx = true} : vector<8x1xf32> -> vector<8x1xf32>
      %113 = vector.extract_strided_slice %87 {offsets = [0, 24], sizes = [8, 8], strides = [1, 1]} : vector<8x36xf32> to vector<8x8xf32>
      %114 = vector.broadcast %112 : vector<8x1xf32> to vector<8x8xf32>
      %115 = arith.mulf %113, %114 : vector<8x8xf32>
      %116 = tpu.concatenate %94, %101, %108, %115 in 1 : vector<8x8xf32>, vector<8x8xf32>, vector<8x8xf32>, vector<8x8xf32> -> vector<8x32xf32>
      %c0_28 = arith.constant 0 : index
      %c0_29 = arith.constant 0 : index
      %117 = vector.load %arg7[%c0_28, %c0_29] : memref<1x32xf32, #tpu.memory_space<vmem>>, vector<1x32xf32>
      %118 = vector.broadcast %117 : vector<1x32xf32> to vector<8x32xf32>
      %119 = arith.mulf %116, %118 : vector<8x32xf32>
      %c0_30 = arith.constant 0 : index
      %c0_31 = arith.constant 0 : index
      %120 = vector.load %arg8[%c0_30, %c0_31] : memref<1x32xf32, #tpu.memory_space<vmem>>, vector<1x32xf32>
      %121 = vector.broadcast %120 : vector<1x32xf32> to vector<8x32xf32>
      %122 = arith.addf %119, %121 : vector<8x32xf32>
      %cst_32 = arith.constant 0.000000e+00 : f32
      %123 = vector.broadcast %cst_32 : f32 to vector<8x32xf32>
      %124 = arith.maximumf %122, %123 : vector<8x32xf32>
      %125 = arith.truncf %124 : vector<8x32xf32> to vector<8x32xbf16>
      %c0_33 = arith.constant 0 : index
      %c0_34 = arith.constant 0 : index
      %126 = vector.load %arg9[%c0_33, %c0_34] : memref<8x32xbf16, #tpu.memory_space<vmem>>, vector<8x32xbf16>
      tpu.vector_store %arg9[%c0_33, %c0_34], %125 {strides = array<i32>} : memref<8x32xbf16, #tpu.memory_space<vmem>>, vector<8x32xbf16>,
    } else {
    }
    return
  }
  func.func @transform_0(%arg0: i32, %arg1: i32) -> (i32, i32) {
    %c0_i32 = arith.constant 0 : i32
    %c0_i32_0 = arith.constant 0 : i32
    %c0_i32_1 = arith.constant 0 : i32
    return %c0_i32, %c0_i32_0 : i32, i32
  }
  func.func @transform_1(%arg0: i32, %arg1: i32) -> (i32, i32) {
    %c0_i32 = arith.constant 0 : i32
    %c0_i32_0 = arith.constant 0 : i32
    %c0_i32_1 = arith.constant 0 : i32
    return %c0_i32, %c0_i32_0 : i32, i32
  }
  func.func @transform_2(%arg0: i32, %arg1: i32) -> (i32, i32) {
    %c0_i32 = arith.constant 0 : i32
    %c0_i32_0 = arith.constant 0 : i32
    %c0_i32_1 = arith.constant 0 : i32
    return %c0_i32, %c0_i32_0 : i32, i32
  }
  func.func @transform_3(%arg0: i32, %arg1: i32) -> (i32, i32) {
    %c0_i32 = arith.constant 0 : i32
    %c0_i32_0 = arith.constant 0 : i32
    %c0_i32_1 = arith.constant 0 : i32
    return %c0_i32, %c0_i32_0 : i32, i32
  }
  func.func @transform_4(%arg0: i32, %arg1: i32) -> (i32, i32) {
    %c0_i32 = arith.constant 0 : i32
    return %arg0, %arg1 : i32, i32
  }
  func.func @transform_5(%arg0: i32, %arg1: i32) -> (i32, i32) {
    %c0_i32 = arith.constant 0 : i32
    %c0_i32_0 = arith.constant 0 : i32
    %c0_i32_1 = arith.constant 0 : i32
    return %c0_i32, %c0_i32_0 : i32, i32
  }
  func.func @transform_6(%arg0: i32, %arg1: i32) -> (i32, i32) {
    %c0_i32 = arith.constant 0 : i32
    %c0_i32_0 = arith.constant 0 : i32
    %c0_i32_1 = arith.constant 0 : i32
    return %c0_i32, %c0_i32_0 : i32, i32
  }
  func.func @transform_7(%arg0: i32, %arg1: i32) -> (i32, i32) {
    %c0_i32 = arith.constant 0 : i32
    %c0_i32_0 = arith.constant 0 : i32
    return %arg0, %c0_i32 : i32, i32
  }
}

</mosaic_0001>

<bundles_post_ra>
// kernel: tpu_custom_call.1
= control target key start
LH: loop header
LB: loop body
LE: loop exit
PB: predicated region body
PF: predicated region fallthrough
CT: control target
= control target key end

     0   :  { %s2711_s24 = smov 0   ;;  %s2713_s25 = smov 0   ;;  %s3840_s0 = inlined_call_operand.vmem [shape: f32[256,8], index: 0, kind: input, shape index: {}]   ;;  %s3841_s1 = inlined_call_operand.vmem [shape: f32[8,32], index: 1, kind: input, shape index: {}]   ;;  %s3842_s2 = inlined_call_operand.vmem [shape: f32[32,4], index: 2, kind: input, shape index: {}]   ;;  %s3843_s3 = inlined_call_operand.vmem [shape: f32[32,4], index: 3, kind: input, shape index: {}]   ;;  %s3844_s4 = inlined_call_operand.vmem [shape: bf16[256,256], index: 4, kind: input, shape index: {}]   ;;  %s3845_s5 = inlined_call_operand.vmem [shape: f32[1,32], index: 5, kind: input, shape index: {}]   ;;  %s3846_s6 = inlined_call_operand.vmem [shape: f32[1,32], index: 6, kind: input, shape index: {}]   ;;  %s3847_s7 = inlined_call_operand.vmem [shape: bf16[256,32], index: 7, kind: output, shape index: {}]  }
   0x1   :  { %s2715_s26 = smov 0   ;;  %s2717_s27 = smov 0  }
   0x2   :  { %s2719_s28 = smov 0  }
   0x3 LB: > { %s26_s29 = sadd.s32 1, %s2650_s26  ;;  %s29_s30 = sadd.s32 1, %s2654_s27  ;;  %s2658_s28 = sphi %s2719_s28, %s17_s28   ;;  %s2654_s27 = sphi %s2717_s27, %s3851_s27   ;;  %s2650_s26 = sphi %s2715_s26, %s3850_s26   ;;  %s2646_s25 = sphi %s2713_s25, %s3849_s25   ;;  %s2642_s24 = sphi %s2711_s24, %s3848_s24  }
   0x4   : > { %p27_p0 = scmp.ge.s32.totalorder %s26_s29, 2  ;;  %p2137_p1 = scmp.ge.s32.totalorder %s2658_s28, 1 }
   0x5   : > { %p254_p2 = scmp.lt.s32.totalorder %s2658_s28, 65 }
   0x6   : > { %s3853_s29 = smov (%p27_p0, %s26_s29), 0  ;;  %s3855_s30 = smov (!%p27_p0, %s29_s30), %s2654_s27 }
   0x7   : > { %p255_p3 = pnand %p2137_p1, %p254_p2  ;;  %p31_p4 = scmp.ge.s32.totalorder %s3855_s30, 32 }
   0x8   : > { %p288_p5 = scmp.lt.s32.totalorder (!%p255_p3), %s2646_s25, 31  ;;  %p290_p6 = scmp.lt.s32.totalorder (!%p255_p3), %s2642_s24, 1 }
   0x9   : > { %s3857_s30 = smov (%p31_p4, %s3855_s30), 0  ;;  %258 = sbr.rel (%p255_p3) target bundleno = 1178 (0x49a), region = 48 }
   0xa   : > { %p301_p7 = scmp.eq.s32.totalorder (!%p255_p3), %s2646_s25, 0  ;;  %p302_p8 = scmp.eq.s32.totalorder (!%p255_p3), %s2642_s24, 0 }
   0xc   : > { %p303_p9 = pnand (!%p255_p3), %p302_p8, %p301_p7 }
  0x10   : > { %s289_s8 = scalar_select %p288_p5, %s2646_s25, 31 }
  0x11   : > { %s291_s9 = scalar_select %p290_p6, %s2642_s24, 1 }
  0x12   : > { %s2138_s10 = sshll.u32 %s289_s8, 1  ;;  %s2140_s11 = sshll.u32 %s289_s8, 2  ;;  %v355_v0 = vld [vmem:[%s3841_s1] sm:$0xff] (!%p303_p9)  ;;  %vm406_vm0 = vcmask (!%p303_p9), 1043456   ;;  %v308_v2 = vld [vmem:[%s3840_s0 + $0x8] sm:$0xff] (!%p303_p9)  ;;  %vm357_vm1 = vcmask (!%p303_p9), 64512   ;;  %v1295_v3 = vlaneseq (!%p303_p9) }
  0x13   : > { %s293_s12 = sadd.s32 %s2138_s10, %s291_s9  ;;  %s2754_s15 = scalar_lea.vmem %s3847_s7, %s2140_s11  ;;  %v307_v1 = vld [vmem:[%s3840_s0] sm:$0xff] (!%p303_p9)  ;;  %v356_v4 = vpack.c.bf16 (!%p303_p9), %v355_v0, %v355_v0  ;;  %v309_v6 = vld [vmem:[%s3840_s0 + $0x10] sm:$0xff] (!%p303_p9)  ;;  %v310_v7 = vld [vmem:[%s3840_s0 + $0x18] sm:$0xff] (!%p303_p9)  ;;  %v2660_v15 = vmov (!%p303_p9), 0.0   ;;  %vm1376_vm6 = vcmask (!%p303_p9), 130048   ;;  %vm1448_vm7 = vcmask (!%p303_p9), 195584  }
  0x14   : > { %s2139_s16 = sshll.u32 %s293_s12, 2  ;;  %306 = sbr.rel (%p303_p9) target bundleno = 616 (0x268), region = 52  ;;  %v339_v5 = vpack.c.bf16 (!%p303_p9), %v308_v2, %v307_v1  ;;  %v311_v8 = vld [vmem:[%s3840_s0 + $0x20] sm:$0xff] (!%p303_p9)  ;;  %v312_v9 = vld [vmem:[%s3840_s0 + $0x28] sm:$0xff] (!%p303_p9)  ;;  %v1296_v10 = vand.u32 (!%p303_p9), 127, %v1295_v3  ;;  %v340_v12 = vpack.c.bf16 (!%p303_p9), %v310_v7, %v309_v6  ;;  %v325_v19 = vld [vmem:[%s3840_s0 + $0x90] sm:$0xff] (!%p303_p9) }
  0x15   : > { %s2759_s19 = scalar_lea.vmem %s3844_s4, %s2139_s16  ;;  %2534 = vmatprep.subr.msk.bf16.mxu0 (!%p303_p9), %vm406_vm0, %v356_v4  ;;  %v408_v11 = vsel (!%p303_p9), %vm406_vm0, %v356_v4, 0  ;;  %v341_v13 = vpack.c.bf16 (!%p303_p9), %v312_v9, %v311_v8  ;;  %2535 = vmatprep.subr.msk.bf16.mxu1 (!%p303_p9), %vm406_vm0, %v356_v4  ;;  %v323_v14 = vld [vmem:[%s3840_s0 + $0x80] sm:$0xff] (!%p303_p9)  ;;  %v324_v18 = vld [vmem:[%s3840_s0 + $0x88] sm:$0xff] (!%p303_p9)  ;;  %v326_v20 = vld [vmem:[%s3840_s0 + $0x98] sm:$0xff] (!%p303_p9)  ;;  %s2661_s22 = smov (!%p303_p9), 32   ;;  %vm575_vm8 = vcmask (!%p303_p9), 261120  }
  0x16   : > { %2372 = vmatprep.mubr.msk.bf16.mxu0 (!%p303_p9), %vm357_vm1, %v339_v5  ;;  %2371 = vmatpush3.bf16.msra.mxu0 (!%p303_p9), %v408_v11  ;;  %vm1297_vm2 = vcmp.eq.s32.totalorder (!%p303_p9), %v1296_v10, 0  ;;  %vm1353_vm3 = vcmp.eq.s32.totalorder (!%p303_p9), %v1296_v10, 1  ;;  %vm1425_vm4 = vcmp.eq.s32.totalorder (!%p303_p9), %v1296_v10, 2  ;;  %vm1497_vm5 = vcmp.eq.s32.totalorder (!%p303_p9), %v1296_v10, 3  ;;  %v327_v25 = vld [vmem:[%s3840_s0 + $0xa0] sm:$0xff] (!%p303_p9)  ;;  %v328_v26 = vld [vmem:[%s3840_s0 + $0xa8] sm:$0xff] (!%p303_p9) }
  0x17   : > { %2533 = vmatpush3.bf16.msra.mxu1 (!%p303_p9), %v408_v11  ;;  %v2221_v16 = vsel (!%p303_p9), %vm1297_vm2, 1.0, %v2660_v15  ;;  %v2222_v17 = vsel (!%p303_p9), %vm1353_vm3, 1.0, %v2660_v15  ;;  %v2223_v22 = vsel (!%p303_p9), %vm1425_vm4, 1.0, %v2660_v15  ;;  %v347_v23 = vpack.c.bf16 (!%p303_p9), %v324_v18, %v323_v14  ;;  %v313_v28 = vld [vmem:[%s3840_s0 + $0x30] sm:$0xff] (!%p303_p9)  ;;  %v314_v29 = vld [vmem:[%s3840_s0 + $0x38] sm:$0xff] (!%p303_p9)  ;;  %v315_v32 = vld [vmem:[%s3840_s0 + $0x40] sm:$0xff] (!%p303_p9) }
  0x18   : > { %v2587_v21 = vpack.i.bf16 (!%p303_p9), %v2222_v17, %v2221_v16  ;;  %v348_v24 = vpack.c.bf16 (!%p303_p9), %v326_v20, %v325_v19  ;;  %v2224_v27 = vsel (!%p303_p9), %vm1497_vm5, 1.0, %v2660_v15  ;;  %v349_v30 = vpack.c.bf16 (!%p303_p9), %v328_v26, %v327_v25  ;;  %v316_v33 = vld [vmem:[%s3840_s0 + $0x48] sm:$0xff] (!%p303_p9)  ;;  %v329_v34 = vld [vmem:[%s3840_s0 + $0xb0] sm:$0xff] (!%p303_p9)  ;;  %v330_v35 = vld [vmem:[%s3840_s0 + $0xb8] sm:$0xff] (!%p303_p9) }
  0x19   : > { %2373 = vmatmul.mubr.msk.bf16.vlgmr.msra.gmra.mrb[0].mxu0 (!%p303_p9), %vm357_vm1, %v340_v12  ;;  %v2592_v31 = vpack.i.bf16 (!%p303_p9), %v2224_v27, %v2223_v22  ;;  %2388 = vmatprep.mubr.msk.bf16.mxu1 (!%p303_p9), %vm357_vm1, %v347_v23  ;;  %v331_v36 = vld [vmem:[%s3840_s0 + $0xc0] sm:$0xff] (!%p303_p9)  ;;  %v332_v37 = vld [vmem:[%s3840_s0 + $0xc8] sm:$0xff] (!%p303_p9)  ;;  %v342_v38 = vpack.c.bf16 (!%p303_p9), %v314_v29, %v313_v28  ;;  %v573_v41 = vld [vmem:[%s3842_s2 + $0x10] sm:$0xff] (!%p303_p9)  ;;  %v343_v42 = vpack.c.bf16 (!%p303_p9), %v316_v33, %v315_v32  ;;  %vm1344_vm9 = vcmask (!%p303_p9), 293888  }
  0x1a   : > { %2376 = vmatprep.mubr.msk.bf16.mxu0 (!%p303_p9), %vm357_vm1, %v341_v13  ;;  %2588 = vrot.lane.b32.xlu1 (!%p303_p9), %v2587_v21, %s2661_s22  ;;  %v571_v39 = vld [vmem:[%s3842_s2] sm:$0xff] (!%p303_p9)  ;;  %v572_v40 = vld [vmem:[%s3842_s2 + $0x8] sm:$0xff] (!%p303_p9)  ;;  %v574_v44 = vld [vmem:[%s3842_s2 + $0x18] sm:$0xff] (!%p303_p9)  ;;  %v350_v49 = vpack.c.bf16 (!%p303_p9), %v330_v35, %v329_v34  ;;  %v351_v50 = vpack.c.bf16 (!%p303_p9), %v332_v37, %v331_v36  ;;  %vm1126_vm10 = vcmask (!%p303_p9), 31744   ;;  %vm1228_vm11 = vcmask (!%p303_p9), 24576  }
  0x1b   : > { %2389 = vmatmul.mubr.msk.bf16.vlgmr.msra.gmra.mrb[0].mxu1 %vm357_vm1, %v348_v24  ;;  %v2516_v43 = vpack.c.bf16 %v572_v40, %v571_v39  ;;  %v897_v45 = vld [vmem:[%s3843_s3] sm:$0xff]  ;;  %v898_v46 = vld [vmem:[%s3843_s3 + $0x8] sm:$0xff]  ;;  %v2520_v47 = vpack.c.bf16 %v574_v44, %v573_v41  ;;  %v317_v51 = vld [vmem:[%s3840_s0 + $0x50] sm:$0xff] }
  0x1c   : > { %2392 = vmatprep.mubr.msk.bf16.mxu1 %vm357_vm1, %v349_v30  ;;  %v2524_v48 = vpack.c.bf16 %v898_v46, %v897_v45  ;;  %v318_v52 = vld [vmem:[%s3840_s0 + $0x58] sm:$0xff]  ;;  %v319_v53 = vld [vmem:[%s3840_s0 + $0x60] sm:$0xff]  ;;  %v320_v54 = vld [vmem:[%s3840_s0 + $0x68] sm:$0xff] }
  0x1d   : > { %2517 = vmatprep.subr.bf16.mxu1 %v2516_v43  ;;  %v344_v55 = vpack.c.bf16 %v318_v52, %v317_v51  ;;  %v333_v56 = vld [vmem:[%s3840_s0 + $0xd0] sm:$0xff]  ;;  %v334_v57 = vld [vmem:[%s3840_s0 + $0xd8] sm:$0xff]  ;;  %v345_v58 = vpack.c.bf16 %v320_v54, %v319_v53  ;;  %v335_v59 = vld [vmem:[%s3840_s0 + $0xe0] sm:$0xff] }
  0x1e   : > { %2593 = vrot.lane.b32.xlu1 %v2592_v31, %s2661_s22  ;;  %2519 = vmatpush3.bf16.msra.mxu1 %v2516_v43  ;;  %v336_v60 = vld [vmem:[%s3840_s0 + $0xe8] sm:$0xff]  ;;  %v352_v61 = vpack.c.bf16 %v334_v57, %v333_v56  ;;  %v321_v63 = vld [vmem:[%s3840_s0 + $0x70] sm:$0xff]  ;;  %v322_v0 = vld [vmem:[%s3840_s0 + $0x78] sm:$0xff] }
  0x1f   : > { %2521 = vmatprep.subr.bf16.mxu1 %v2520_v47  ;;  %2525 = vmatprep.subr.bf16.mxu0 %v2524_v48  ;;  %v353_v62 = vpack.c.bf16 %v336_v60, %v335_v59  ;;  %v346_v1 = vpack.c.bf16 %v322_v0, %v321_v63  ;;  %v337_v2 = vld [vmem:[%s3840_s0 + $0xf0] sm:$0xff]  ;;  %v338_v3 = vld [vmem:[%s3840_s0 + $0xf8] sm:$0xff] }
  0x20   : > { %2527 = vmatpush3.bf16.msra.mxu0 %v2524_v48  ;;  %v354_v4 = vpack.c.bf16 %v338_v3, %v337_v2  ;;  %v899_v5 = vld [vmem:[%s3843_s3 + $0x10] sm:$0xff]  ;;  %v900_v6 = vld [vmem:[%s3843_s3 + $0x18] sm:$0xff] }
  0x21   : > { %2377 = vmatmul.mubr.msk.bf16.gmra.mrb[4].mxu0 %vm357_vm1, %v342_v38  ;;  %v2528_v7 = vpack.c.bf16 %v900_v6, %v899_v5 }
  0x22   : > { %2380 = vmatprep.mubr.msk.bf16.mxu0 %vm357_vm1, %v343_v42  ;;  %2523 = vmatpush3.bf16.msra.mxu1 %v2520_v47 }
  0x23   : > { %2393 = vmatmul.mubr.msk.bf16.gmra.mrb[4].mxu1 %vm357_vm1, %v350_v49  ;;  %2529 = vmatprep.subr.bf16.mxu0 %v2528_v7 }
  0x24   : > { %2396 = vmatprep.mubr.msk.bf16.mxu1 %vm357_vm1, %v351_v50  ;;  %2531 = vmatpush3.bf16.msra.mxu0 %v2528_v7 }
  0x29   : > { %2381 = vmatmul.mubr.msk.bf16.gmra.mrb[8].mxu0 %vm357_vm1, %v344_v55 }
  0x2a   : > { %2384 = vmatprep.mubr.msk.bf16.mxu0 %vm357_vm1, %v345_v58 }
  0x2b   : > { %2397 = vmatmul.mubr.msk.bf16.gmra.mrb[8].mxu1 %vm357_vm1, %v352_v61 }
  0x2c   : > { %2400 = vmatprep.mubr.msk.bf16.mxu1 %vm357_vm1, %v353_v62 }
  0x31   : > { %2385 = vmatmul.mubr.msk.bf16.gmra.mrb[12].mxu0 %vm357_vm1, %v346_v1 }
  0x33   : > { %2401 = vmatmul.mubr.msk.bf16.gmra.mrb[12].mxu1 %vm357_vm1, %v354_v4 }
  0x8c   : > { %v2589_v8 = vpop.permute.xlu1 %2588 }
  0x8d   : > { %v2903_v10 = vunpack.i.l.bf16 %v2589_v8  ;;  %v2907_v12 = vunpack.i.h.bf16 %v2589_v8 }
  0x90   : > { %v2594_v9 = vpop.permute.xlu1 %2593 }
  0x91   : > { %v2905_v11 = vunpack.i.h.bf16 %v2594_v9  ;;  %v2909_v13 = vunpack.i.l.bf16 %v2594_v9 }
  0xec   : > { %v2374_v14 = vpop.f32.mrb[0].mxu0 }
  0xed   : > { %v1306_v15 = vsel %vm357_vm1, %v2374_v14, 0.0  ;;  %v1362_v16 = vsel %vm357_vm1, 0.0, %v2374_v14  ;;  %v1434_v17 = vsel %vm1376_vm6, 0.0, %v2374_v14  ;;  %v1506_v18 = vsel %vm1448_vm7, 0.0, %v2374_v14  ;;  %v444_v19 = vpop.f32.mrb[1].mxu0 }
  0xee   : > { %v1322_v20 = vsel %vm575_vm8, %v1306_v15, %v2903_v10  ;;  %v1379_v21 = vsel %vm1376_vm6, %v1362_v16, 0.0  ;;  %v1451_v22 = vsel %vm1448_vm7, %v1434_v17, 0.0  ;;  %v1522_v23 = vsel %vm575_vm8, %v1506_v18, %v2905_v11  ;;  %v2375_v24 = vpop.f32.mrb[2].mxu0  ;;  %2412 = vmatprep.mubr.msk.f32.mxu1 %vm575_vm8, %v444_v19  ;;  %2468 = vmatprep.mubr.msk.f32.mxu0 %vm575_vm8, %v444_v19  ;;  %v2929_v30 = vpop.f32.mrb[0].mxu1 }
  0xef   : > { %v1395_v25 = vsel %vm575_vm8, %v1379_v21, %v2907_v12  ;;  %v1467_v26 = vsel %vm575_vm8, %v1451_v22, %v2909_v13  ;;  %v1304_v27 = vsel %vm357_vm1, %v444_v19, 0.0  ;;  %v1360_v28 = vsel %vm357_vm1, 0.0, %v444_v19  ;;  %v447_v29 = vpop.f32.mrb[3].mxu0  ;;  %v2938_v35 = vpop.f32.mrb[1].mxu1 }
  0xf0   : > { %v1320_v31 = vsel %vm575_vm8, %v1304_v27, %v2903_v10  ;;  %v1377_v32 = vsel %vm1376_vm6, %v1360_v28, 0.0  ;;  %v1432_v33 = vsel %vm1376_vm6, 0.0, %v444_v19  ;;  %v1504_v34 = vsel %vm1448_vm7, 0.0, %v444_v19  ;;  %2413 = vmatmul.mubr.msk.f32.vlgmr.msra.gmra.mrb[16].mxu1 %vm575_vm8, %v447_v29  ;;  %2469 = vmatmul.mubr.msk.f32.vlgmr.msra.gmra.mrb[16].mxu0 %vm575_vm8, %v447_v29  ;;  %v2950_v40 = vpop.f32.mrb[2].mxu1 }
  0xf1   : > { %v2942_v36 = vsel %vm575_vm8, %v1377_v32, %v2907_v12  ;;  %v1449_v37 = vsel %vm1448_vm7, %v1432_v33, 0.0  ;;  %v1520_v38 = vsel %vm575_vm8, %v1504_v34, %v2905_v11  ;;  %v1307_v39 = vsel %vm357_vm1, %v2375_v24, 0.0  ;;  %2415 = vmatprep.mubr.msk.f32.mxu1 %vm575_vm8, %v2374_v14  ;;  %2471 = vmatprep.mubr.msk.f32.mxu0 %vm575_vm8, %v2374_v14  ;;  %v2958_v45 = vpop.f32.mrb[3].mxu1 }
  0xf2   : > { %v1465_v41 = vsel %vm575_vm8, %v1449_v37, %v2909_v13  ;;  %v1323_v42 = vsel %vm575_vm8, %v1307_v39, %v2903_v10  ;;  %v1363_v43 = vsel %vm357_vm1, 0.0, %v2375_v24  ;;  %v1435_v44 = vsel %vm1376_vm6, 0.0, %v2375_v24 }
  0xf3   : > { %v1337_v46 = vpack.c.bf16 %v1323_v42, %v1322_v20  ;;  %v1380_v47 = vsel %vm1376_vm6, %v1363_v43, 0.0  ;;  %v1452_v48 = vsel %vm1448_vm7, %v1435_v44, 0.0  ;;  %v1507_v49 = vsel %vm1448_vm7, 0.0, %v2375_v24 }
  0xf4   : > { %v1396_v50 = vsel %vm575_vm8, %v1380_v47, %v2907_v12  ;;  %v1468_v51 = vsel %vm575_vm8, %v1452_v48, %v2909_v13  ;;  %v1523_v52 = vsel %vm575_vm8, %v1507_v49, %v2905_v11  ;;  %v1305_v53 = vsel %vm357_vm1, %v447_v29, 0.0  ;;  %v2378_v54 = vpop.f32.mrb[4].mxu0  ;;  %2416 = vmatmul.mubr.msk.f32.gmra.mrb[18].mxu1 %vm575_vm8, %v2375_v24  ;;  %2472 = vmatmul.mubr.msk.f32.gmra.mrb[18].mxu0 %vm575_vm8, %v2375_v24 }
  0xf5   : > { %1346 = vst.msk [vmem:[#allocation2 + $0x8] sm:$0xff] %vm1344_vm9, %v1337_v46  ;;  %v1410_v55 = vpack.c.bf16 %v1396_v50, %v1395_v25  ;;  %v1482_v56 = vpack.c.bf16 %v1468_v51, %v1467_v26  ;;  %v1537_v57 = vpack.c.bf16 %v1523_v52, %v1522_v23  ;;  %v1321_v58 = vsel %vm575_vm8, %v1305_v53, %v2903_v10  ;;  %v460_v59 = vpop.f32.mrb[5].mxu0 }
  0xf6   : > { %v1336_v60 = vpack.c.bf16 %v1321_v58, %v1320_v31  ;;  %v1361_v61 = vsel %vm357_vm1, 0.0, %v447_v29  ;;  %v1433_v62 = vsel %vm1376_vm6, 0.0, %v447_v29  ;;  %v1505_v63 = vsel %vm1448_vm7, 0.0, %v447_v29  ;;  %v2379_v0 = vpop.f32.mrb[6].mxu0  ;;  %2418 = vmatprep.mubr.msk.f32.mxu1 %vm575_vm8, %v460_v59  ;;  %2474 = vmatprep.mubr.msk.f32.mxu0 %vm575_vm8, %v460_v59  ;;  %v2990_v6 = vpop.f32.mrb[4].mxu1 }
  0xf7   : > { %1418 = vst.msk [vmem:[#allocation2 + $0x48] sm:$0xff] %vm1344_vm9, %v1410_v55  ;;  %1490 = vst.msk [vmem:[#allocation2 + $0x88] sm:$0xff] %vm1344_vm9, %v1482_v56  ;;  %v1378_v1 = vsel %vm1376_vm6, %v1361_v61, 0.0  ;;  %v1450_v2 = vsel %vm1448_vm7, %v1433_v62, 0.0  ;;  %v1521_v3 = vsel %vm575_vm8, %v1505_v63, %v2905_v11  ;;  %v1310_v4 = vsel %vm357_vm1, %v2378_v54, 0.0  ;;  %v2988_v5 = vpop.f32.mrb[7].mxu0 }
  0xf8   : > { %1545 = vst.msk [vmem:[#allocation2 + $0xc8] sm:$0xff] %vm1344_vm9, %v1537_v57  ;;  %1345 = vst.msk [vmem:[#allocation2] sm:$0xff] %vm1344_vm9, %v1336_v60  ;;  %v1394_v7 = vsel %vm575_vm8, %v1378_v1, %v2907_v12  ;;  %v1466_v8 = vsel %vm575_vm8, %v1450_v2, %v2909_v13  ;;  %v1536_v9 = vpack.c.bf16 %v1521_v3, %v1520_v38  ;;  %2419 = vmatmul.mubr.msk.f32.gmra.mrb[20].mxu1 %vm575_vm8, %v2988_v5  ;;  %v3001_v15 = vpop.f32.mrb[5].mxu1 }
  0xf9   : > { %v1326_v14 = vsel %vm575_vm8, %v1310_v4, %v2903_v10  ;;  %v1409_v16 = vpack.c.bf16 %v1394_v7, %v2942_v36  ;;  %v1481_v17 = vpack.c.bf16 %v1466_v8, %v1465_v41  ;;  %v1366_v18 = vsel %vm357_vm1, 0.0, %v2378_v54  ;;  %2475 = vmatmul.mubr.msk.f32.gmra.mrb[20].mxu0 %vm575_vm8, %v2988_v5  ;;  %2421 = vmatprep.mubr.msk.f32.mxu1 %vm575_vm8, %v2378_v54  ;;  %v3009_v20 = vpop.f32.mrb[6].mxu1 }
  0xfa   : > { %v1438_v19 = vsel %vm1376_vm6, 0.0, %v2378_v54  ;;  %1544 = vst.msk [vmem:[#allocation2 + $0xc0] sm:$0xff] %vm1344_vm9, %v1536_v9  ;;  %v1383_v21 = vsel %vm1376_vm6, %v1366_v18, 0.0  ;;  %v1510_v23 = vsel %vm1448_vm7, 0.0, %v2378_v54  ;;  %v1308_v24 = vsel %vm357_vm1, %v460_v59, 0.0  ;;  %2477 = vmatprep.mubr.msk.f32.mxu0 %vm575_vm8, %v2378_v54  ;;  %v3017_v25 = vpop.f32.mrb[7].mxu1 }
  0xfb   : > { %v1455_v22 = vsel %vm1448_vm7, %v1438_v19, 0.0  ;;  %1417 = vst.msk [vmem:[#allocation2 + $0x40] sm:$0xff] %vm1344_vm9, %v1409_v16  ;;  %1489 = vst.msk [vmem:[#allocation2 + $0x80] sm:$0xff] %vm1344_vm9, %v1481_v17  ;;  %v1399_v26 = vsel %vm575_vm8, %v1383_v21, %v2907_v12  ;;  %v1526_v28 = vsel %vm575_vm8, %v1510_v23, %v2905_v11  ;;  %v1324_v29 = vsel %vm575_vm8, %v1308_v24, %v2903_v10 }
  0xfc   : > { %v1471_v27 = vsel %vm575_vm8, %v1455_v22, %v2909_v13  ;;  %v1364_v31 = vsel %vm357_vm1, 0.0, %v460_v59  ;;  %v1436_v32 = vsel %vm1376_vm6, 0.0, %v460_v59  ;;  %v1508_v33 = vsel %vm1448_vm7, 0.0, %v460_v59  ;;  %v3033_v36 = vpop.f32.mrb[8].mxu0  ;;  %2422 = vmatmul.mubr.msk.f32.gmra.mrb[22].mxu1 %vm575_vm8, %v2379_v0 }
  0xfd   : > { %v1311_v34 = vsel %vm357_vm1, %v2379_v0, 0.0  ;;  %v1381_v37 = vsel %vm1376_vm6, %v1364_v31, 0.0  ;;  %v1453_v38 = vsel %vm1448_vm7, %v1436_v32, 0.0  ;;  %v1524_v39 = vsel %vm575_vm8, %v1508_v33, %v2905_v11  ;;  %2478 = vmatmul.mubr.msk.f32.gmra.mrb[22].mxu0 %vm575_vm8, %v2379_v0  ;;  %v3043_v42 = vpop.f32.mrb[9].mxu0 }
  0xfe   : > { %v1327_v41 = vsel %vm575_vm8, %v1311_v34, %v2903_v10  ;;  %v1397_v43 = vsel %vm575_vm8, %v1381_v37, %v2907_v12  ;;  %v1469_v44 = vsel %vm575_vm8, %v1453_v38, %v2909_v13  ;;  %v1367_v47 = vsel %vm357_vm1, 0.0, %v2379_v0  ;;  %v3050_v48 = vpop.f32.mrb[10].mxu0  ;;  %2424 = vmatprep.mubr.msk.f32.mxu1 %vm575_vm8, %v3043_v42  ;;  %2480 = vmatprep.mubr.msk.f32.mxu0 %vm575_vm8, %v3043_v42  ;;  %v3063_v54 = vpop.f32.mrb[8].mxu1 }
  0xff   : > { %v1339_v46 = vpack.c.bf16 %v1327_v41, %v1326_v14  ;;  %v1384_v49 = vsel %vm1376_vm6, %v1367_v47, 0.0  ;;  %v1439_v50 = vsel %vm1376_vm6, 0.0, %v2379_v0  ;;  %v1511_v51 = vsel %vm1448_vm7, 0.0, %v2379_v0  ;;  %v3061_v53 = vpop.f32.mrb[11].mxu0  ;;  %v3075_v59 = vpop.f32.mrb[9].mxu1 }
 0x100   : > { %v1309_v52 = vsel %vm357_vm1, %v2988_v5, 0.0  ;;  %v1400_v55 = vsel %vm575_vm8, %v1384_v49, %v2907_v12  ;;  %v1456_v56 = vsel %vm1448_vm7, %v1439_v50, 0.0  ;;  %v1527_v57 = vsel %vm575_vm8, %v1511_v51, %v2905_v11  ;;  %2425 = vmatmul.mubr.msk.f32.gmra.mrb[24].mxu1 %vm575_vm8, %v3061_v53  ;;  %v3081_v0 = vpop.f32.mrb[10].mxu1 }
 0x101   : > { %1348 = vst.msk [vmem:[#allocation2 + $0x18] sm:$0xff] %vm1344_vm9, %v1339_v46  ;;  %v1325_v58 = vsel %vm575_vm8, %v1309_v52, %v2903_v10  ;;  %v1412_v60 = vpack.c.bf16 %v1400_v55, %v1399_v26  ;;  %v1472_v61 = vsel %vm575_vm8, %v1456_v56, %v2909_v13  ;;  %v1539_v62 = vpack.c.bf16 %v1527_v57, %v1526_v28  ;;  %v3093_v7 = vpop.f32.mrb[11].mxu1 }
 0x102   : > { %v1338_v63 = vpack.c.bf16 %v1325_v58, %v1324_v29  ;;  %2481 = vmatmul.mubr.msk.f32.gmra.mrb[24].mxu0 %vm575_vm8, %v3061_v53  ;;  %v1484_v1 = vpack.c.bf16 %v1472_v61, %v1471_v27  ;;  %v1365_v2 = vsel %vm357_vm1, 0.0, %v2988_v5  ;;  %v1437_v3 = vsel %vm1376_vm6, 0.0, %v2988_v5  ;;  %2427 = vmatprep.mubr.msk.f32.mxu1 %vm575_vm8, %v3033_v36 }
 0x103   : > { %v1509_v4 = vsel %vm1448_vm7, 0.0, %v2988_v5  ;;  %2483 = vmatprep.mubr.msk.f32.mxu0 %vm575_vm8, %v3033_v36  ;;  %1420 = vst.msk [vmem:[#allocation2 + $0x58] sm:$0xff] %vm1344_vm9, %v1412_v60  ;;  %1547 = vst.msk [vmem:[#allocation2 + $0xd8] sm:$0xff] %vm1344_vm9, %v1539_v62  ;;  %v1382_v8 = vsel %vm1376_vm6, %v1365_v2, 0.0  ;;  %v1454_v9 = vsel %vm1448_vm7, %v1437_v3, 0.0  ;;  %v1314_v14 = vsel %vm357_vm1, %v3033_v36, 0.0 }
 0x104   : > { %1347 = vst.msk [vmem:[#allocation2 + $0x10] sm:$0xff] %vm1344_vm9, %v1338_v63  ;;  %v1525_v5 = vsel %vm575_vm8, %v1509_v4, %v2905_v11  ;;  %1492 = vst.msk [vmem:[#allocation2 + $0x98] sm:$0xff] %vm1344_vm9, %v1484_v1  ;;  %v1398_v16 = vsel %vm575_vm8, %v1382_v8, %v2907_v12  ;;  %v1470_v17 = vsel %vm575_vm8, %v1454_v9, %v2909_v13  ;;  %v3111_v21 = vpop.f32.mrb[12].mxu0  ;;  %2428 = vmatmul.mubr.msk.f32.gmra.mrb[26].mxu1 %vm575_vm8, %v3050_v48 }
 0x105   : > { %v1538_v18 = vpack.c.bf16 %v1525_v5, %v1524_v39  ;;  %v1330_v19 = vsel %vm575_vm8, %v1314_v14, %v2903_v10  ;;  %v1411_v22 = vpack.c.bf16 %v1398_v16, %v1397_v43  ;;  %v1483_v23 = vpack.c.bf16 %v1470_v17, %v1469_v44  ;;  %v3121_v27 = vpop.f32.mrb[13].mxu0 }
 0x106   : > { %v1370_v24 = vsel %vm357_vm1, 0.0, %v3033_v36  ;;  %v1442_v26 = vsel %vm1376_vm6, 0.0, %v3033_v36  ;;  %2484 = vmatmul.mubr.msk.f32.gmra.mrb[26].mxu0 %vm575_vm8, %v3050_v48  ;;  %v1514_v31 = vsel %vm1448_vm7, 0.0, %v3033_v36  ;;  %v1312_v32 = vsel %vm357_vm1, %v3043_v42, 0.0  ;;  %v3130_v33 = vpop.f32.mrb[14].mxu0  ;;  %2430 = vmatprep.mubr.msk.f32.mxu1 %vm575_vm8, %v3121_v27  ;;  %v3148_v41 = vpop.f32.mrb[12].mxu1 }
 0x107   : > { %1546 = vst.msk [vmem:[#allocation2 + $0xd0] sm:$0xff] %vm1344_vm9, %v1538_v18  ;;  %v1387_v28 = vsel %vm1376_vm6, %v1370_v24, 0.0  ;;  %v1459_v29 = vsel %vm1448_vm7, %v1442_v26, 0.0  ;;  %2486 = vmatprep.mubr.msk.f32.mxu0 %vm575_vm8, %v3121_v27  ;;  %1419 = vst.msk [vmem:[#allocation2 + $0x50] sm:$0xff] %vm1344_vm9, %v1411_v22  ;;  %v1530_v37 = vsel %vm575_vm8, %v1514_v31, %v2905_v11  ;;  %v1328_v38 = vsel %vm575_vm8, %v1312_v32, %v2903_v10  ;;  %v3146_v39 = vpop.f32.mrb[15].mxu0  ;;  %v3160_v49 = vpop.f32.mrb[13].mxu1 }
 0x108   : > { %1491 = vst.msk [vmem:[#allocation2 + $0x90] sm:$0xff] %vm1344_vm9, %v1483_v23  ;;  %v1403_v34 = vsel %vm575_vm8, %v1387_v28, %v2907_v12  ;;  %v1475_v36 = vsel %vm575_vm8, %v1459_v29, %v2909_v13  ;;  %v1368_v43 = vsel %vm357_vm1, 0.0, %v3043_v42  ;;  %v1440_v44 = vsel %vm1376_vm6, 0.0, %v3043_v42  ;;  %2431 = vmatmul.mubr.msk.f32.gmra.mrb[28].mxu1 %vm575_vm8, %v3146_v39 }
 0x109   : > { %v1512_v46 = vsel %vm1448_vm7, 0.0, %v3043_v42  ;;  %v1315_v47 = vsel %vm357_vm1, %v3050_v48, 0.0  ;;  %v1385_v50 = vsel %vm1376_vm6, %v1368_v43, 0.0  ;;  %v1457_v51 = vsel %vm1448_vm7, %v1440_v44, 0.0  ;;  %2433 = vmatprep.mubr.msk.f32.mxu1 %vm575_vm8, %v3111_v21  ;;  %v3172_v42 = vpop.f32.mrb[14].mxu1 }
 0x10a   : > { %v1528_v52 = vsel %vm575_vm8, %v1512_v46, %v2905_v11  ;;  %v1331_v55 = vsel %vm575_vm8, %v1315_v47, %v2903_v10  ;;  %2487 = vmatmul.mubr.msk.f32.gmra.mrb[28].mxu0 %vm575_vm8, %v3146_v39  ;;  %v1401_v56 = vsel %vm575_vm8, %v1385_v50, %v2907_v12  ;;  %v1473_v57 = vsel %vm575_vm8, %v1457_v51, %v2909_v13  ;;  %v3182_v61 = vpop.f32.mrb[15].mxu1 }
 0x10b   : > { %v1341_v58 = vpack.c.bf16 %v1331_v55, %v1330_v19  ;;  %v1371_v60 = vsel %vm357_vm1, 0.0, %v3050_v48  ;;  %2489 = vmatprep.mubr.msk.f32.mxu0 %vm575_vm8, %v3111_v21  ;;  %v1443_v63 = vsel %vm1376_vm6, 0.0, %v3050_v48  ;;  %v1515_v1 = vsel %vm1448_vm7, 0.0, %v3050_v48 }
 0x10c   : > { %v1388_v62 = vsel %vm1376_vm6, %v1371_v60, 0.0  ;;  %v1313_v2 = vsel %vm357_vm1, %v3061_v53, 0.0  ;;  %v1460_v4 = vsel %vm1448_vm7, %v1443_v63, 0.0  ;;  %v1531_v8 = vsel %vm575_vm8, %v1515_v1, %v2905_v11  ;;  %2434 = vmatmul.mubr.msk.f32.gmra.mrb[30].mxu1 %vm575_vm8, %v3130_v33 }
 0x10d   : > { %1350 = vst.msk [vmem:[#allocation2 + $0x28] sm:$0xff] %vm1344_vm9, %v1341_v58  ;;  %v1404_v3 = vsel %vm575_vm8, %v1388_v62, %v2907_v12  ;;  %v1329_v9 = vsel %vm575_vm8, %v1313_v2, %v2903_v10  ;;  %v1476_v5 = vsel %vm575_vm8, %v1460_v4, %v2909_v13  ;;  %v1541_v14 = vpack.c.bf16 %v1531_v8, %v1530_v37 }
 0x10e   : > { %v1414_v48 = vpack.c.bf16 %v1404_v3, %v1403_v34  ;;  %v1340_v16 = vpack.c.bf16 %v1329_v9, %v1328_v38  ;;  %2490 = vmatmul.mubr.msk.f32.gmra.mrb[30].mxu0 %vm575_vm8, %v3130_v33  ;;  %v1486_v17 = vpack.c.bf16 %v1476_v5, %v1475_v36  ;;  %v1369_v18 = vsel %vm357_vm1, 0.0, %v3061_v53  ;;  %2436 = vmatprep.mubr.msk.f32.mxu1 %vm575_vm8, %v2938_v35 }
 0x10f   : > { %v1441_v19 = vsel %vm1376_vm6, 0.0, %v3061_v53  ;;  %v1513_v22 = vsel %vm1448_vm7, 0.0, %v3061_v53  ;;  %2492 = vmatprep.mubr.msk.f32.mxu0 %vm575_vm8, %v2938_v35  ;;  %1549 = vst.msk [vmem:[#allocation2 + $0xe8] sm:$0xff] %vm1344_vm9, %v1541_v14  ;;  %v1386_v23 = vsel %vm1376_vm6, %v1369_v18, 0.0  ;;  %v1318_v53 = vsel %vm357_vm1, %v3111_v21, 0.0 }
 0x110   : > { %1422 = vst.msk [vmem:[#allocation2 + $0x68] sm:$0xff] %vm1344_vm9, %v1414_v48  ;;  %1349 = vst.msk [vmem:[#allocation2 + $0x20] sm:$0xff] %vm1344_vm9, %v1340_v16  ;;  %v1458_v24 = vsel %vm1448_vm7, %v1441_v19, 0.0  ;;  %v1529_v26 = vsel %vm575_vm8, %v1513_v22, %v2905_v11  ;;  %v1402_v28 = vsel %vm575_vm8, %v1386_v23, %v2907_v12  ;;  %v1334_v32 = vsel %vm575_vm8, %v1318_v53, %v2903_v10 }
 0x111   : > { %1494 = vst.msk [vmem:[#allocation2 + $0xa8] sm:$0xff] %vm1344_vm9, %v1486_v17  ;;  %v1474_v29 = vsel %vm575_vm8, %v1458_v24, %v2909_v13  ;;  %v1540_v31 = vpack.c.bf16 %v1529_v26, %v1528_v52  ;;  %2437 = vmatmul.mubr.msk.f32.gmra.mrb[32].mxu1 %vm575_vm8, %v2958_v45  ;;  %v1413_v34 = vpack.c.bf16 %v1402_v28, %v1401_v56  ;;  %v1374_v37 = vsel %vm357_vm1, 0.0, %v3111_v21 }
 0x112   : > { %v1485_v36 = vpack.c.bf16 %v1474_v29, %v1473_v57  ;;  %v1446_v38 = vsel %vm1376_vm6, 0.0, %v3111_v21  ;;  %2493 = vmatmul.mubr.msk.f32.gmra.mrb[32].mxu0 %vm575_vm8, %v2958_v45  ;;  %2439 = vmatprep.mubr.msk.f32.mxu1 %vm575_vm8, %v2929_v30  ;;  %v1391_v43 = vsel %vm1376_vm6, %v1374_v37, 0.0  ;;  %v1518_v46 = vsel %vm1448_vm7, 0.0, %v3111_v21 }
 0x113   : > { %1548 = vst.msk [vmem:[#allocation2 + $0xe0] sm:$0xff] %vm1344_vm9, %v1540_v31  ;;  %v1463_v44 = vsel %vm1448_vm7, %v1446_v38, 0.0  ;;  %v1316_v47 = vsel %vm357_vm1, %v3121_v27, 0.0  ;;  %2495 = vmatprep.mubr.msk.f32.mxu0 %vm575_vm8, %v2929_v30  ;;  %1421 = vst.msk [vmem:[#allocation2 + $0x60] sm:$0xff] %vm1344_vm9, %v1413_v34  ;;  %v1407_v50 = vsel %vm575_vm8, %v1391_v43, %v2907_v12  ;;  %v1534_v52 = vsel %vm575_vm8, %v1518_v46, %v2905_v11 }
 0x114   : > { %1493 = vst.msk [vmem:[#allocation2 + $0xa0] sm:$0xff] %vm1344_vm9, %v1485_v36  ;;  %v1479_v51 = vsel %vm575_vm8, %v1463_v44, %v2909_v13  ;;  %v1332_v21 = vsel %vm575_vm8, %v1316_v47, %v2903_v10  ;;  %v1372_v55 = vsel %vm357_vm1, 0.0, %v3121_v27  ;;  %v1444_v56 = vsel %vm1376_vm6, 0.0, %v3121_v27 }
 0x115   : > { %v1516_v57 = vsel %vm1448_vm7, 0.0, %v3121_v27  ;;  %v1319_v58 = vsel %vm357_vm1, %v3130_v33, 0.0  ;;  %2440 = vmatmul.mubr.msk.f32.gmra.mrb[34].mxu1 %vm575_vm8, %v2950_v40  ;;  %v1389_v60 = vsel %vm1376_vm6, %v1372_v55, 0.0  ;;  %v1461_v62 = vsel %vm1448_vm7, %v1444_v56, 0.0 }
 0x116   : > { %v1532_v63 = vsel %vm575_vm8, %v1516_v57, %v2905_v11  ;;  %v1335_v1 = vsel %vm575_vm8, %v1319_v58, %v2903_v10  ;;  %2496 = vmatmul.mubr.msk.f32.gmra.mrb[34].mxu0 %vm575_vm8, %v2950_v40  ;;  %2442 = vmatprep.mubr.msk.f32.mxu1 %vm575_vm8, %v3001_v15  ;;  %v1405_v27 = vsel %vm575_vm8, %v1389_v60, %v2907_v12  ;;  %v1375_v4 = vsel %vm357_vm1, 0.0, %v3130_v33 }
 0x117   : > { %v1477_v2 = vsel %vm575_vm8, %v1461_v62, %v2909_v13  ;;  %v1343_v3 = vpack.c.bf16 %v1335_v1, %v1334_v32  ;;  %2498 = vmatprep.mubr.msk.f32.mxu0 %vm575_vm8, %v3001_v15  ;;  %v1392_v8 = vsel %vm1376_vm6, %v1375_v4, 0.0  ;;  %v1447_v9 = vsel %vm1376_vm6, 0.0, %v3130_v33 }
 0x118   : > { %v1519_v48 = vsel %vm1448_vm7, 0.0, %v3130_v33  ;;  %v1317_v5 = vsel %vm357_vm1, %v3146_v39, 0.0  ;;  %v1408_v14 = vsel %vm575_vm8, %v1392_v8, %v2907_v12  ;;  %v1464_v16 = vsel %vm1448_vm7, %v1447_v9, 0.0 }
 0x119   : > { %1352 = vst.msk [vmem:[#allocation2 + $0x38] sm:$0xff] %vm1344_vm9, %v1343_v3  ;;  %v1535_v17 = vsel %vm575_vm8, %v1519_v48, %v2905_v11  ;;  %v1333_v18 = vsel %vm575_vm8, %v1317_v5, %v2903_v10  ;;  %2443 = vmatmul.mubr.msk.f32.gmra.mrb[36].mxu1 %vm575_vm8, %v3017_v25  ;;  %v1416_v33 = vpack.c.bf16 %v1408_v14, %v1407_v50  ;;  %v1373_v26 = vsel %vm357_vm1, 0.0, %v3146_v39 }
 0x11a   : > { %v1480_v19 = vsel %vm575_vm8, %v1464_v16, %v2909_v13  ;;  %v1543_v22 = vpack.c.bf16 %v1535_v17, %v1534_v52  ;;  %v1342_v23 = vpack.c.bf16 %v1333_v18, %v1332_v21  ;;  %2499 = vmatmul.mubr.msk.f32.gmra.mrb[36].mxu0 %vm575_vm8, %v3017_v25  ;;  %v1445_v53 = vsel %vm1376_vm6, 0.0, %v3146_v39  ;;  %2445 = vmatprep.mubr.msk.f32.mxu1 %vm575_vm8, %v2990_v6 }
 0x11b   : > { %v1488_v24 = vpack.c.bf16 %v1480_v19, %v1479_v51  ;;  %v1517_v28 = vsel %vm1448_vm7, 0.0, %v3146_v39  ;;  %2501 = vmatprep.mubr.msk.f32.mxu0 %vm575_vm8, %v2990_v6  ;;  %1424 = vst.msk [vmem:[#allocation2 + $0x78] sm:$0xff] %vm1344_vm9, %v1416_v33  ;;  %v1390_v29 = vsel %vm1376_vm6, %v1373_v26, 0.0  ;;  %v1462_v31 = vsel %vm1448_vm7, %v1445_v53, 0.0 }
 0x11c   : > { %1551 = vst.msk [vmem:[#allocation2 + $0xf8] sm:$0xff] %vm1344_vm9, %v1543_v22  ;;  %1351 = vst.msk [vmem:[#allocation2 + $0x30] sm:$0xff] %vm1344_vm9, %v1342_v23  ;;  %v1533_v32 = vsel %vm575_vm8, %v1517_v28, %v2905_v11  ;;  %v1556_v39 = vsel %vm357_vm1, %v2929_v30, 0.0  ;;  %v1406_v34 = vsel %vm575_vm8, %v1390_v29, %v2907_v12  ;;  %v1478_v36 = vsel %vm575_vm8, %v1462_v31, %v2909_v13 }
 0x11d   : > { %1496 = vst.msk [vmem:[#allocation2 + $0xb8] sm:$0xff] %vm1344_vm9, %v1488_v24  ;;  %v1542_v37 = vpack.c.bf16 %v1533_v32, %v1532_v63  ;;  %v1572_v38 = vsel %vm575_vm8, %v1556_v39, %v2903_v10  ;;  %2446 = vmatmul.mubr.msk.f32.gmra.mrb[38].mxu1 %vm575_vm8, %v3009_v20  ;;  %v1415_v43 = vpack.c.bf16 %v1406_v34, %v1405_v27  ;;  %v1605_v46 = vsel %vm357_vm1, 0.0, %v2929_v30 }
 0x11e   : > { %v1487_v44 = vpack.c.bf16 %v1478_v36, %v1477_v2  ;;  %v1669_v47 = vsel %vm1376_vm6, 0.0, %v2929_v30  ;;  %2502 = vmatmul.mubr.msk.f32.gmra.mrb[38].mxu0 %vm575_vm8, %v3009_v20  ;;  %2448 = vmatprep.mubr.msk.f32.mxu1 %vm575_vm8, %v3075_v59  ;;  %v1621_v50 = vsel %vm1376_vm6, %v1605_v46, 0.0  ;;  %v1733_v52 = vsel %vm1448_vm7, 0.0, %v2929_v30 }
 0x11f   : > { %1550 = vst.msk [vmem:[#allocation2 + $0xf0] sm:$0xff] %vm1344_vm9, %v1542_v37  ;;  %v1685_v51 = vsel %vm1448_vm7, %v1669_v47, 0.0  ;;  %v1554_v21 = vsel %vm357_vm1, %v2938_v35, 0.0  ;;  %2504 = vmatprep.mubr.msk.f32.mxu0 %vm575_vm8, %v3075_v59  ;;  %1423 = vst.msk [vmem:[#allocation2 + $0x70] sm:$0xff] %vm1344_vm9, %v1415_v43  ;;  %v1637_v55 = vsel %vm575_vm8, %v1621_v50, %v2907_v12  ;;  %v1749_v57 = vsel %vm575_vm8, %v1733_v52, %v2905_v11 }
 0x120   : > { %1495 = vst.msk [vmem:[#allocation2 + $0xb0] sm:$0xff] %vm1344_vm9, %v1487_v44  ;;  %v1701_v56 = vsel %vm575_vm8, %v1685_v51, %v2909_v13  ;;  %v1570_v30 = vsel %vm575_vm8, %v1554_v21, %v2903_v10  ;;  %v1603_v58 = vsel %vm357_vm1, 0.0, %v2938_v35  ;;  %v1667_v60 = vsel %vm1376_vm6, 0.0, %v2938_v35 }
 0x121   : > { %v1731_v62 = vsel %vm1448_vm7, 0.0, %v2938_v35  ;;  %v1557_v63 = vsel %vm357_vm1, %v2950_v40, 0.0  ;;  %2449 = vmatmul.mubr.msk.f32.gmra.mrb[40].mxu1 %vm575_vm8, %v3093_v7  ;;  %v1619_v1 = vsel %vm1376_vm6, %v1603_v58, 0.0  ;;  %v1683_v27 = vsel %vm1448_vm7, %v1667_v60, 0.0 }
 0x122   : > { %v1747_v2 = vsel %vm575_vm8, %v1731_v62, %v2905_v11  ;;  %v1573_v3 = vsel %vm575_vm8, %v1557_v63, %v2903_v10  ;;  %2451 = vmatprep.mubr.msk.f32.mxu1 %vm575_vm8, %v3063_v54  ;;  %2505 = vmatmul.mubr.msk.f32.gmra.mrb[40].mxu0 %vm575_vm8, %v3093_v7  ;;  %v1635_v35 = vsel %vm575_vm8, %v1619_v1, %v2907_v12  ;;  %v1606_v9 = vsel %vm357_vm1, 0.0, %v2950_v40 }
 0x123   : > { %v1699_v4 = vsel %vm575_vm8, %v1683_v27, %v2909_v13  ;;  %v1587_v8 = vpack.c.bf16 %v1573_v3, %v1572_v38  ;;  %2507 = vmatprep.mubr.msk.f32.mxu0 %vm575_vm8, %v3063_v54  ;;  %v1622_v48 = vsel %vm1376_vm6, %v1606_v9, 0.0  ;;  %v1670_v5 = vsel %vm1376_vm6, 0.0, %v2950_v40 }
 0x124   : > { %v1734_v14 = vsel %vm1448_vm7, 0.0, %v2950_v40  ;;  %v1555_v16 = vsel %vm357_vm1, %v2958_v45, 0.0  ;;  %v1638_v17 = vsel %vm575_vm8, %v1622_v48, %v2907_v12  ;;  %v1686_v18 = vsel %vm1448_vm7, %v1670_v5, 0.0 }
 0x125   : > { %1596 = vst.msk [vmem:[#allocation2 + $0x108] sm:$0xff] %vm1344_vm9, %v1587_v8  ;;  %v1750_v33 = vsel %vm575_vm8, %v1734_v14, %v2905_v11  ;;  %v1571_v19 = vsel %vm575_vm8, %v1555_v16, %v2903_v10  ;;  %2452 = vmatmul.mubr.msk.f32.gmra.mrb[42].mxu1 %vm575_vm8, %v3081_v0  ;;  %v1652_v40 = vpack.c.bf16 %v1638_v17, %v1637_v55  ;;  %v1604_v53 = vsel %vm357_vm1, 0.0, %v2958_v45 }
 0x126   : > { %v1702_v22 = vsel %vm575_vm8, %v1686_v18, %v2909_v13  ;;  %v1764_v23 = vpack.c.bf16 %v1750_v33, %v1749_v57  ;;  %v1586_v24 = vpack.c.bf16 %v1571_v19, %v1570_v30  ;;  %2454 = vmatprep.mubr.msk.f32.mxu1 %vm575_vm8, %v3160_v49  ;;  %v1668_v28 = vsel %vm1376_vm6, 0.0, %v2958_v45  ;;  %2508 = vmatmul.mubr.msk.f32.gmra.mrb[42].mxu0 %vm575_vm8, %v3081_v0 }
 0x127   : > { %v1716_v26 = vpack.c.bf16 %v1702_v22, %v1701_v56  ;;  %v1732_v29 = vsel %vm1448_vm7, 0.0, %v2958_v45  ;;  %1660 = vst.msk [vmem:[#allocation2 + $0x148] sm:$0xff] %vm1344_vm9, %v1652_v40  ;;  %v1620_v31 = vsel %vm1376_vm6, %v1604_v53, 0.0  ;;  %v1684_v32 = vsel %vm1448_vm7, %v1668_v28, 0.0  ;;  %2510 = vmatprep.mubr.msk.f32.mxu0 %vm575_vm8, %v3160_v49 }
 0x128   : > { %1772 = vst.msk [vmem:[#allocation2 + $0x1c8] sm:$0xff] %vm1344_vm9, %v1764_v23  ;;  %1595 = vst.msk [vmem:[#allocation2 + $0x100] sm:$0xff] %vm1344_vm9, %v1586_v24  ;;  %v1748_v39 = vsel %vm575_vm8, %v1732_v29, %v2905_v11  ;;  %v1560_v34 = vsel %vm357_vm1, %v2990_v6, 0.0  ;;  %v1636_v45 = vsel %vm575_vm8, %v1620_v31, %v2907_v12  ;;  %v1700_v36 = vsel %vm575_vm8, %v1684_v32, %v2909_v13 }
 0x129   : > { %1724 = vst.msk [vmem:[#allocation2 + $0x188] sm:$0xff] %vm1344_vm9, %v1716_v26  ;;  %v1763_v37 = vpack.c.bf16 %v1748_v39, %v1747_v2  ;;  %v1576_v38 = vsel %vm575_vm8, %v1560_v34, %v2903_v10  ;;  %2455 = vmatmul.mubr.msk.f32.gmra.mrb[44].mxu1 %vm575_vm8, %v3182_v61  ;;  %v1651_v43 = vpack.c.bf16 %v1636_v45, %v1635_v35  ;;  %v1609_v46 = vsel %vm357_vm1, 0.0, %v2990_v6 }
 0x12a   : > { %v1715_v44 = vpack.c.bf16 %v1700_v36, %v1699_v4  ;;  %v1673_v47 = vsel %vm1376_vm6, 0.0, %v2990_v6  ;;  %2457 = vmatprep.mubr.msk.f32.mxu1 %vm575_vm8, %v3148_v41  ;;  %v1625_v50 = vsel %vm1376_vm6, %v1609_v46, 0.0  ;;  %v1737_v52 = vsel %vm1448_vm7, 0.0, %v2990_v6  ;;  %2511 = vmatmul.mubr.msk.f32.gmra.mrb[44].mxu0 %vm575_vm8, %v3182_v61 }
 0x12b   : > { %1771 = vst.msk [vmem:[#allocation2 + $0x1c0] sm:$0xff] %vm1344_vm9, %v1763_v37  ;;  %v1689_v51 = vsel %vm1448_vm7, %v1673_v47, 0.0  ;;  %v1558_v21 = vsel %vm357_vm1, %v3001_v15, 0.0  ;;  %1659 = vst.msk [vmem:[#allocation2 + $0x140] sm:$0xff] %vm1344_vm9, %v1651_v43  ;;  %v1641_v55 = vsel %vm575_vm8, %v1625_v50, %v2907_v12  ;;  %v1753_v57 = vsel %vm575_vm8, %v1737_v52, %v2905_v11  ;;  %2513 = vmatprep.mubr.msk.f32.mxu0 %vm575_vm8, %v3148_v41 }
 0x12c   : > { %1723 = vst.msk [vmem:[#allocation2 + $0x180] sm:$0xff] %vm1344_vm9, %v1715_v44  ;;  %v1705_v56 = vsel %vm575_vm8, %v1689_v51, %v2909_v13  ;;  %v1574_v6 = vsel %vm575_vm8, %v1558_v21, %v2903_v10  ;;  %v1607_v30 = vsel %vm357_vm1, 0.0, %v3001_v15  ;;  %v1671_v58 = vsel %vm1376_vm6, 0.0, %v3001_v15 }
 0x12d   : > { %v1735_v60 = vsel %vm1448_vm7, 0.0, %v3001_v15  ;;  %v1561_v62 = vsel %vm357_vm1, %v3009_v20, 0.0  ;;  %2458 = vmatmul.mubr.msk.f32.gmra.mrb[46].mxu1 %vm575_vm8, %v3172_v42  ;;  %v1623_v63 = vsel %vm1376_vm6, %v1607_v30, 0.0  ;;  %v1687_v1 = vsel %vm1448_vm7, %v1671_v58, 0.0 }
 0x12e   : > { %v1751_v27 = vsel %vm575_vm8, %v1735_v60, %v2905_v11  ;;  %v1577_v2 = vsel %vm575_vm8, %v1561_v62, %v2903_v10  ;;  %v1639_v3 = vsel %vm575_vm8, %v1623_v63, %v2907_v12  ;;  %v1703_v15 = vsel %vm575_vm8, %v1687_v1, %v2909_v13  ;;  %2514 = vmatmul.mubr.msk.f32.gmra.mrb[46].mxu0 %vm575_vm8, %v3172_v42 }
 0x12f   : > { %v1589_v35 = vpack.c.bf16 %v1577_v2, %v1576_v38  ;;  %v1610_v4 = vsel %vm357_vm1, 0.0, %v3009_v20  ;;  %v1674_v9 = vsel %vm1376_vm6, 0.0, %v3009_v20  ;;  %v1738_v48 = vsel %vm1448_vm7, 0.0, %v3009_v20 }
 0x130   : > { %v1626_v8 = vsel %vm1376_vm6, %v1610_v4, 0.0  ;;  %v1559_v5 = vsel %vm357_vm1, %v3017_v25, 0.0  ;;  %v1690_v16 = vsel %vm1448_vm7, %v1674_v9, 0.0  ;;  %v1754_v17 = vsel %vm575_vm8, %v1738_v48, %v2905_v11 }
 0x131   : > { %1598 = vst.msk [vmem:[#allocation2 + $0x118] sm:$0xff] %vm1344_vm9, %v1589_v35  ;;  %v1642_v14 = vsel %vm575_vm8, %v1626_v8, %v2907_v12  ;;  %v1575_v18 = vsel %vm575_vm8, %v1559_v5, %v2903_v10  ;;  %v1706_v20 = vsel %vm575_vm8, %v1690_v16, %v2909_v13  ;;  %v1766_v19 = vpack.c.bf16 %v1754_v17, %v1753_v57 }
 0x132   : > { %v1654_v33 = vpack.c.bf16 %v1642_v14, %v1641_v55  ;;  %v1588_v40 = vpack.c.bf16 %v1575_v18, %v1574_v6  ;;  %v1718_v22 = vpack.c.bf16 %v1706_v20, %v1705_v56  ;;  %v1608_v23 = vsel %vm357_vm1, 0.0, %v3017_v25 }
 0x133   : > { %v1672_v24 = vsel %vm1376_vm6, 0.0, %v3017_v25  ;;  %v1736_v26 = vsel %vm1448_vm7, 0.0, %v3017_v25  ;;  %1774 = vst.msk [vmem:[#allocation2 + $0x1d8] sm:$0xff] %vm1344_vm9, %v1766_v19  ;;  %v1624_v53 = vsel %vm1376_vm6, %v1608_v23, 0.0  ;;  %v1564_v31 = vsel %vm357_vm1, %v3063_v54, 0.0 }
 0x134   : > { %1662 = vst.msk [vmem:[#allocation2 + $0x158] sm:$0xff] %vm1344_vm9, %v1654_v33  ;;  %1597 = vst.msk [vmem:[#allocation2 + $0x110] sm:$0xff] %vm1344_vm9, %v1588_v40  ;;  %v1688_v28 = vsel %vm1448_vm7, %v1672_v24, 0.0  ;;  %v1752_v29 = vsel %vm575_vm8, %v1736_v26, %v2905_v11  ;;  %v1640_v25 = vsel %vm575_vm8, %v1624_v53, %v2907_v12  ;;  %v1580_v34 = vsel %vm575_vm8, %v1564_v31, %v2903_v10 }
 0x135   : > { %1726 = vst.msk [vmem:[#allocation2 + $0x198] sm:$0xff] %vm1344_vm9, %v1718_v22  ;;  %v1704_v32 = vsel %vm575_vm8, %v1688_v28, %v2909_v13  ;;  %v1765_v39 = vpack.c.bf16 %v1752_v29, %v1751_v27  ;;  %v1653_v45 = vpack.c.bf16 %v1640_v25, %v1639_v3  ;;  %v1613_v37 = vsel %vm357_vm1, 0.0, %v3063_v54 }
 0x136   : > { %v1717_v36 = vpack.c.bf16 %v1704_v32, %v1703_v15  ;;  %v1677_v38 = vsel %vm1376_vm6, 0.0, %v3063_v54  ;;  %v1629_v43 = vsel %vm1376_vm6, %v1613_v37, 0.0  ;;  %v1741_v46 = vsel %vm1448_vm7, 0.0, %v3063_v54 }
 0x137   : > { %1773 = vst.msk [vmem:[#allocation2 + $0x1d0] sm:$0xff] %vm1344_vm9, %v1765_v39  ;;  %v1693_v44 = vsel %vm1448_vm7, %v1677_v38, 0.0  ;;  %v1562_v47 = vsel %vm357_vm1, %v3075_v59, 0.0  ;;  %1661 = vst.msk [vmem:[#allocation2 + $0x150] sm:$0xff] %vm1344_vm9, %v1653_v45  ;;  %v1645_v50 = vsel %vm575_vm8, %v1629_v43, %v2907_v12  ;;  %v1757_v52 = vsel %vm575_vm8, %v1741_v46, %v2905_v11 }
 0x138   : > { %1725 = vst.msk [vmem:[#allocation2 + $0x190] sm:$0xff] %vm1344_vm9, %v1717_v36  ;;  %v1709_v51 = vsel %vm575_vm8, %v1693_v44, %v2909_v13  ;;  %v1578_v21 = vsel %vm575_vm8, %v1562_v47, %v2903_v10  ;;  %v1611_v54 = vsel %vm357_vm1, 0.0, %v3075_v59  ;;  %v1675_v55 = vsel %vm1376_vm6, 0.0, %v3075_v59 }
 0x139   : > { %v1739_v56 = vsel %vm1448_vm7, 0.0, %v3075_v59  ;;  %v1565_v57 = vsel %vm357_vm1, %v3081_v0, 0.0  ;;  %v1627_v6 = vsel %vm1376_vm6, %v1611_v54, 0.0  ;;  %v1691_v30 = vsel %vm1448_vm7, %v1675_v55, 0.0 }
 0x13a   : > { %v1755_v58 = vsel %vm575_vm8, %v1739_v56, %v2905_v11  ;;  %v1581_v60 = vsel %vm575_vm8, %v1565_v57, %v2903_v10  ;;  %v1643_v62 = vsel %vm575_vm8, %v1627_v6, %v2907_v12  ;;  %v1707_v63 = vsel %vm575_vm8, %v1691_v30, %v2909_v13 }
 0x13b   : > { %v1591_v59 = vpack.c.bf16 %v1581_v60, %v1580_v34  ;;  %v1614_v1 = vsel %vm357_vm1, 0.0, %v3081_v0  ;;  %v1678_v2 = vsel %vm1376_vm6, 0.0, %v3081_v0  ;;  %v1742_v3 = vsel %vm1448_vm7, 0.0, %v3081_v0 }
 0x13c   : > { %v1630_v27 = vsel %vm1376_vm6, %v1614_v1, 0.0  ;;  %v1563_v15 = vsel %vm357_vm1, %v3093_v7, 0.0  ;;  %v1694_v4 = vsel %vm1448_vm7, %v1678_v2, 0.0  ;;  %v1758_v8 = vsel %vm575_vm8, %v1742_v3, %v2905_v11 }
 0x13d   : > { %1600 = vst.msk [vmem:[#allocation2 + $0x128] sm:$0xff] %vm1344_vm9, %v1591_v59  ;;  %v1646_v35 = vsel %vm575_vm8, %v1630_v27, %v2907_v12  ;;  %v1579_v9 = vsel %vm575_vm8, %v1563_v15, %v2903_v10  ;;  %v1710_v0 = vsel %vm575_vm8, %v1694_v4, %v2909_v13  ;;  %v1768_v5 = vpack.c.bf16 %v1758_v8, %v1757_v52 }
 0x13e   : > { %v1656_v48 = vpack.c.bf16 %v1646_v35, %v1645_v50  ;;  %v1590_v14 = vpack.c.bf16 %v1579_v9, %v1578_v21  ;;  %v1720_v16 = vpack.c.bf16 %v1710_v0, %v1709_v51  ;;  %v1612_v17 = vsel %vm357_vm1, 0.0, %v3093_v7 }
 0x13f   : > { %v1676_v18 = vsel %vm1376_vm6, 0.0, %v3093_v7  ;;  %v1740_v33 = vsel %vm1448_vm7, 0.0, %v3093_v7  ;;  %1776 = vst.msk [vmem:[#allocation2 + $0x1e8] sm:$0xff] %vm1344_vm9, %v1768_v5  ;;  %v1628_v20 = vsel %vm1376_vm6, %v1612_v17, 0.0  ;;  %v1568_v22 = vsel %vm357_vm1, %v3148_v41, 0.0 }
 0x140   : > { %1664 = vst.msk [vmem:[#allocation2 + $0x168] sm:$0xff] %vm1344_vm9, %v1656_v48  ;;  %1599 = vst.msk [vmem:[#allocation2 + $0x120] sm:$0xff] %vm1344_vm9, %v1590_v14  ;;  %v1692_v19 = vsel %vm1448_vm7, %v1676_v18, 0.0  ;;  %v1756_v40 = vsel %vm575_vm8, %v1740_v33, %v2905_v11  ;;  %v1644_v7 = vsel %vm575_vm8, %v1628_v20, %v2907_v12  ;;  %v1584_v26 = vsel %vm575_vm8, %v1568_v22, %v2903_v10 }
 0x141   : > { %1728 = vst.msk [vmem:[#allocation2 + $0x1a8] sm:$0xff] %vm1344_vm9, %v1720_v16  ;;  %v1708_v23 = vsel %vm575_vm8, %v1692_v19, %v2909_v13  ;;  %v1767_v24 = vpack.c.bf16 %v1756_v40, %v1755_v58  ;;  %v1655_v53 = vpack.c.bf16 %v1644_v7, %v1643_v62  ;;  %v1617_v29 = vsel %vm357_vm1, 0.0, %v3148_v41 }
 0x142   : > { %v1719_v28 = vpack.c.bf16 %v1708_v23, %v1707_v63  ;;  %v1681_v31 = vsel %vm1376_vm6, 0.0, %v3148_v41  ;;  %v1633_v25 = vsel %vm1376_vm6, %v1617_v29, 0.0  ;;  %v1745_v39 = vsel %vm1448_vm7, 0.0, %v3148_v41 }
 0x143   : > { %1775 = vst.msk [vmem:[#allocation2 + $0x1e0] sm:$0xff] %vm1344_vm9, %v1767_v24  ;;  %v1697_v32 = vsel %vm1448_vm7, %v1681_v31, 0.0  ;;  %v1566_v34 = vsel %vm357_vm1, %v3160_v49, 0.0  ;;  %1663 = vst.msk [vmem:[#allocation2 + $0x160] sm:$0xff] %vm1344_vm9, %v1655_v53  ;;  %v1649_v45 = vsel %vm575_vm8, %v1633_v25, %v2907_v12  ;;  %v1761_v37 = vsel %vm575_vm8, %v1745_v39, %v2905_v11 }
 0x144   : > { %1727 = vst.msk [vmem:[#allocation2 + $0x1a0] sm:$0xff] %vm1344_vm9, %v1719_v28  ;;  %v1713_v36 = vsel %vm575_vm8, %v1697_v32, %v2909_v13  ;;  %v1582_v38 = vsel %vm575_vm8, %v1566_v34, %v2903_v10  ;;  %v1615_v41 = vsel %vm357_vm1, 0.0, %v3160_v49  ;;  %v1679_v43 = vsel %vm1376_vm6, 0.0, %v3160_v49 }
 0x145   : > { %v1743_v44 = vsel %vm1448_vm7, 0.0, %v3160_v49  ;;  %v1569_v46 = vsel %vm357_vm1, %v3172_v42, 0.0  ;;  %v1631_v47 = vsel %vm1376_vm6, %v1615_v41, 0.0  ;;  %v1695_v50 = vsel %vm1448_vm7, %v1679_v43, 0.0 }
 0x146   : > { %v1759_v51 = vsel %vm575_vm8, %v1743_v44, %v2905_v11  ;;  %v1585_v52 = vsel %vm575_vm8, %v1569_v46, %v2903_v10  ;;  %v1647_v21 = vsel %vm575_vm8, %v1631_v47, %v2907_v12  ;;  %v1711_v54 = vsel %vm575_vm8, %v1695_v50, %v2909_v13 }
 0x147   : > { %v1593_v49 = vpack.c.bf16 %v1585_v52, %v1584_v26  ;;  %v1618_v55 = vsel %vm357_vm1, 0.0, %v3172_v42  ;;  %v1682_v57 = vsel %vm1376_vm6, 0.0, %v3172_v42  ;;  %v1746_v6 = vsel %vm1448_vm7, 0.0, %v3172_v42 }
 0x148   : > { %v1634_v56 = vsel %vm1376_vm6, %v1618_v55, 0.0  ;;  %v1567_v30 = vsel %vm357_vm1, %v3182_v61, 0.0  ;;  %v1698_v60 = vsel %vm1448_vm7, %v1682_v57, 0.0  ;;  %v1762_v62 = vsel %vm575_vm8, %v1746_v6, %v2905_v11 }
 0x149   : > { %1602 = vst.msk [vmem:[#allocation2 + $0x138] sm:$0xff] %vm1344_vm9, %v1593_v49  ;;  %v1650_v58 = vsel %vm575_vm8, %v1634_v56, %v2907_v12  ;;  %v1583_v63 = vsel %vm575_vm8, %v1567_v30, %v2903_v10  ;;  %v1714_v42 = vsel %vm575_vm8, %v1698_v60, %v2909_v13  ;;  %v1770_v1 = vpack.c.bf16 %v1762_v62, %v1761_v37 }
 0x14a   : > { %v1658_v59 = vpack.c.bf16 %v1650_v58, %v1649_v45  ;;  %v1592_v27 = vpack.c.bf16 %v1583_v63, %v1582_v38  ;;  %v1722_v2 = vpack.c.bf16 %v1714_v42, %v1713_v36  ;;  %v1616_v3 = vsel %vm357_vm1, 0.0, %v3182_v61 }
 0x14b   : > { %v1680_v15 = vsel %vm1376_vm6, 0.0, %v3182_v61  ;;  %v1744_v35 = vsel %vm1448_vm7, 0.0, %v3182_v61  ;;  %1778 = vst.msk [vmem:[#allocation2 + $0x1f8] sm:$0xff] %vm1344_vm9, %v1770_v1  ;;  %v1632_v10 = vsel %vm1376_vm6, %v1616_v3, 0.0 }
 0x14c   : > { %1666 = vst.msk [vmem:[#allocation2 + $0x178] sm:$0xff] %vm1344_vm9, %v1658_v59  ;;  %1601 = vst.msk [vmem:[#allocation2 + $0x130] sm:$0xff] %vm1344_vm9, %v1592_v27  ;;  %v1696_v4 = vsel %vm1448_vm7, %v1680_v15, 0.0  ;;  %v1760_v8 = vsel %vm575_vm8, %v1744_v35, %v2905_v11  ;;  %v1648_v9 = vsel %vm575_vm8, %v1632_v10, %v2907_v12 }
 0x14d   : > { %1730 = vst.msk [vmem:[#allocation2 + $0x1b8] sm:$0xff] %vm1344_vm9, %v1722_v2  ;;  %v1712_v61 = vsel %vm575_vm8, %v1696_v4, %v2909_v13  ;;  %v1769_v48 = vpack.c.bf16 %v1760_v8, %v1759_v51  ;;  %v1657_v0 = vpack.c.bf16 %v1648_v9, %v1647_v21 }
 0x14e   : > { %v1721_v5 = vpack.c.bf16 %v1712_v61, %v1711_v54 }
 0x14f   : > { %1777 = vst.msk [vmem:[#allocation2 + $0x1f0] sm:$0xff] %vm1344_vm9, %v1769_v48  ;;  %1665 = vst.msk [vmem:[#allocation2 + $0x170] sm:$0xff] %vm1344_vm9, %v1657_v0 }
 0x150   : > { %1729 = vst.msk [vmem:[#allocation2 + $0x1b0] sm:$0xff] %vm1344_vm9, %v1721_v5 }
 0x1c3   : > { %v2414_v14 = vpop.f32.mrb[16].mxu1  ;;  %v2470_v11 = vpop.f32.mrb[16].mxu0 }
 0x1c4   : > { %1128 = vst.msk [vmem:[#allocation4 + $0x8] sm:$0xff] %vm1126_vm10, %v2470_v11  ;;  %v738_v16 = vpop.f32.mrb[17].mxu1  ;;  %v967_v17 = vpop.f32.mrb[17].mxu0  ;;  %v1160_v19 = vsel %vm1126_vm10, %v2414_v14, -inf }
 0x1c5   : > { %1127 = vst.msk [vmem:[#allocation4] sm:$0xff] %vm1126_vm10, %v967_v17  ;;  %1230 = vxpose.xlu0.b32.start [1/16] (narrow) %v738_v16, 8  ;;  %v1159_v23 = vsel %vm1126_vm10, %v738_v16, -inf }
 0x1c7   : > { %v2417_v12 = vpop.f32.mrb[18].mxu1  ;;  %v2473_v13 = vpop.f32.mrb[18].mxu0 }
 0x1c8   : > { %1130 = vst.msk [vmem:[#allocation4 + $0x18] sm:$0xff] %vm1126_vm10, %v2473_v13  ;;  %v748_v18 = vpop.f32.mrb[19].mxu1  ;;  %v977_v33 = vpop.f32.mrb[19].mxu0  ;;  %v1162_v31 = vsel %vm1126_vm10, %v2417_v12, -inf }
 0x1c9   : > { %1129 = vst.msk [vmem:[#allocation4 + $0x10] sm:$0xff] %vm1126_vm10, %v977_v33  ;;  %1231 = vxpose.xlu0.b32.cont [2/16] (narrow) %v2414_v14, 8  ;;  %v1161_v34 = vsel %vm1126_vm10, %v748_v18, -inf }
 0x1cb   : > { %v2420_v20 = vpop.f32.mrb[20].mxu1 }
 0x1cc   : > { %v1165_v40 = vsel %vm1126_vm10, %v2420_v20, -inf  ;;  %v2476_v22 = vpop.f32.mrb[20].mxu0  ;;  %v758_v7 = vpop.f32.mrb[21].mxu1 }
 0x1cd   : > { %v1166_v24 = vmax.f32 %v1160_v19, %v1165_v40  ;;  %1132 = vst.msk [vmem:[#allocation4 + $0x28] sm:$0xff] %vm1126_vm10, %v2476_v22  ;;  %v1163_v26 = vsel %vm1126_vm10, %v758_v7, -inf  ;;  %v987_v53 = vpop.f32.mrb[21].mxu0  ;;  %1232 = vxpose.xlu0.b32.cont [3/16] (narrow) %v748_v18, 8 }
 0x1ce   : > { %v1164_v28 = vmax.f32 %v1159_v23, %v1163_v26  ;;  %1131 = vst.msk [vmem:[#allocation4 + $0x20] sm:$0xff] %vm1126_vm10, %v987_v53 }
 0x1cf   : > { %v2423_v29 = vpop.f32.mrb[22].mxu1 }
 0x1d0   : > { %v1169_v25 = vsel %vm1126_vm10, %v2423_v29, -inf  ;;  %v2479_v32 = vpop.f32.mrb[22].mxu0  ;;  %v768_v39 = vpop.f32.mrb[23].mxu1 }
 0x1d1   : > { %v1170_v45 = vmax.f32 %v1162_v31, %v1169_v25  ;;  %1134 = vst.msk [vmem:[#allocation4 + $0x38] sm:$0xff] %vm1126_vm10, %v2479_v32  ;;  %v1167_v36 = vsel %vm1126_vm10, %v768_v39, -inf  ;;  %v997_v37 = vpop.f32.mrb[23].mxu0  ;;  %1233 = vxpose.xlu0.b32.cont [4/16] (narrow) %v2417_v12, 8 }
 0x1d2   : > { %v1168_v38 = vmax.f32 %v1161_v34, %v1167_v36  ;;  %1133 = vst.msk [vmem:[#allocation4 + $0x30] sm:$0xff] %vm1126_vm10, %v997_v37 }
 0x1d3   : > { %v3706_v41 = vpop.f32.mrb[24].mxu1 }
 0x1d4   : > { %v1173_v43 = vsel %vm1126_vm10, %v3706_v41, -inf  ;;  %v778_v46 = vpop.f32.mrb[25].mxu1 }
 0x1d5   : > { %v2482_v44 = vpop.f32.mrb[24].mxu0  ;;  %v1174_v47 = vmax.f32 %v1166_v24, %v1173_v43  ;;  %v1171_v50 = vsel %vm1126_vm10, %v778_v46, -inf  ;;  %1234 = vxpose.xlu0.b32.cont [5/16] (narrow) %v758_v7, 8 }
 0x1d6   : > { %1136 = vst.msk [vmem:[#allocation4 + $0x48] sm:$0xff] %vm1126_vm10, %v2482_v44  ;;  %v1007_v51 = vpop.f32.mrb[25].mxu0  ;;  %v1172_v52 = vmax.f32 %v1164_v28, %v1171_v50 }
 0x1d7   : > { %1135 = vst.msk [vmem:[#allocation4 + $0x40] sm:$0xff] %vm1126_vm10, %v1007_v51  ;;  %v3713_v21 = vpop.f32.mrb[26].mxu1 }
 0x1d8   : > { %v1177_v54 = vsel %vm1126_vm10, %v3713_v21, -inf  ;;  %v788_v55 = vpop.f32.mrb[27].mxu1 }
 0x1d9   : > { %v2485_v49 = vpop.f32.mrb[26].mxu0  ;;  %v1178_v56 = vmax.f32 %v1170_v45, %v1177_v54  ;;  %v1175_v57 = vsel %vm1126_vm10, %v788_v55, -inf  ;;  %1235 = vxpose.xlu0.b32.cont [6/16] (narrow) %v2420_v20, 8 }
 0x1da   : > { %1138 = vst.msk [vmem:[#allocation4 + $0x58] sm:$0xff] %vm1126_vm10, %v2485_v49  ;;  %v1017_v6 = vpop.f32.mrb[27].mxu0  ;;  %v1176_v30 = vmax.f32 %v1168_v38, %v1175_v57 }
 0x1db   : > { %1137 = vst.msk [vmem:[#allocation4 + $0x50] sm:$0xff] %vm1126_vm10, %v1017_v6  ;;  %v3720_v58 = vpop.f32.mrb[28].mxu1 }
 0x1dc   : > { %v1181_v60 = vsel %vm1126_vm10, %v3720_v58, -inf  ;;  %v3724_v63 = vpop.f32.mrb[29].mxu1 }
 0x1dd   : > { %v2488_v62 = vpop.f32.mrb[28].mxu0  ;;  %v1182_v59 = vmax.f32 %v1174_v47, %v1181_v60  ;;  %v1179_v42 = vsel %vm1126_vm10, %v3724_v63, -inf  ;;  %1236 = vxpose.xlu0.b32.cont [7/16] (narrow) %v768_v39, 8 }
 0x1de   : > { %1140 = vst.msk [vmem:[#allocation4 + $0x68] sm:$0xff] %vm1126_vm10, %v2488_v62  ;;  %v1027_v1 = vpop.f32.mrb[29].mxu0  ;;  %v1180_v27 = vmax.f32 %v1172_v52, %v1179_v42 }
 0x1df   : > { %1139 = vst.msk [vmem:[#allocation4 + $0x60] sm:$0xff] %vm1126_vm10, %v1027_v1  ;;  %v3730_v2 = vpop.f32.mrb[30].mxu1 }
 0x1e0   : > { %v1185_v3 = vsel %vm1126_vm10, %v3730_v2, -inf  ;;  %v3734_v35 = vpop.f32.mrb[31].mxu1 }
 0x1e1   : > { %v2491_v15 = vpop.f32.mrb[30].mxu0  ;;  %v1186_v10 = vmax.f32 %v1178_v56, %v1185_v3  ;;  %v1183_v4 = vsel %vm1126_vm10, %v3734_v35, -inf  ;;  %1237 = vxpose.xlu0.b32.cont [8/16] (narrow) %v2423_v29, 8 }
 0x1e2   : > { %1142 = vst.msk [vmem:[#allocation4 + $0x78] sm:$0xff] %vm1126_vm10, %v2491_v15  ;;  %v1037_v8 = vpop.f32.mrb[31].mxu0  ;;  %v1184_v9 = vmax.f32 %v1176_v30, %v1183_v4 }
 0x1e3   : > { %1141 = vst.msk [vmem:[#allocation4 + $0x70] sm:$0xff] %vm1126_vm10, %v1037_v8 }
 0x1e4   : > { %v2438_v61 = vpop.f32.mrb[32].mxu1 }
 0x1e5   : > { %v1189_v48 = vsel %vm1126_vm10, %v2438_v61, -inf  ;;  %v2494_v0 = vpop.f32.mrb[32].mxu0  ;;  %v818_v5 = vpop.f32.mrb[33].mxu1  ;;  %1238 = vxpose.xlu0.b32.cont [9/16] (narrow) %v778_v46, 8 }
 0x1e6   : > { %v1190_v14 = vmax.f32 %v1182_v59, %v1189_v48  ;;  %1144 = vst.msk [vmem:[#allocation4 + $0x88] sm:$0xff] %vm1126_vm10, %v2494_v0  ;;  %v1187_v11 = vsel %vm1126_vm10, %v818_v5, -inf  ;;  %v1047_v16 = vpop.f32.mrb[33].mxu0  ;;  %1262 = vxpose.xlu1.b32.start [1/16] (narrow) %v818_v5, 8 }
 0x1e7   : > { %v1188_v17 = vmax.f32 %v1180_v27, %v1187_v11  ;;  %1143 = vst.msk [vmem:[#allocation4 + $0x80] sm:$0xff] %vm1126_vm10, %v1047_v16 }
 0x1e8   : > { %v2441_v12 = vpop.f32.mrb[34].mxu1 }
 0x1e9   : > { %v1193_v13 = vsel %vm1126_vm10, %v2441_v12, -inf  ;;  %v2497_v18 = vpop.f32.mrb[34].mxu0  ;;  %v828_v33 = vpop.f32.mrb[35].mxu1  ;;  %1239 = vxpose.xlu0.b32.cont [10/16] (narrow) %v3706_v41, 8 }
 0x1ea   : > { %v1194_v20 = vmax.f32 %v1186_v10, %v1193_v13  ;;  %1146 = vst.msk [vmem:[#allocation4 + $0x98] sm:$0xff] %vm1126_vm10, %v2497_v18  ;;  %v1191_v19 = vsel %vm1126_vm10, %v828_v33, -inf  ;;  %v1057_v40 = vpop.f32.mrb[35].mxu0  ;;  %1263 = vxpose.xlu1.b32.cont [2/16] (narrow) %v2438_v61, 8 }
 0x1eb   : > { %v1192_v22 = vmax.f32 %v1184_v9, %v1191_v19  ;;  %1145 = vst.msk [vmem:[#allocation4 + $0x90] sm:$0xff] %vm1126_vm10, %v1057_v40 }
 0x1ec   : > { %v2444_v7 = vpop.f32.mrb[36].mxu1 }
 0x1ed   : > { %v1197_v23 = vsel %vm1126_vm10, %v2444_v7, -inf  ;;  %v838_v24 = vpop.f32.mrb[37].mxu1  ;;  %v2500_v26 = vpop.f32.mrb[36].mxu0  ;;  %1240 = vxpose.xlu0.b32.cont [11/16] (narrow) %v788_v55, 8 }
 0x1ee   : > { %v1198_v53 = vmax.f32 %v1190_v14, %v1197_v23  ;;  %v1195_v28 = vsel %vm1126_vm10, %v838_v24, -inf  ;;  %1148 = vst.msk [vmem:[#allocation4 + $0xa8] sm:$0xff] %vm1126_vm10, %v2500_v26  ;;  %1264 = vxpose.xlu1.b32.cont [3/16] (narrow) %v828_v33, 8  ;;  %v1067_v29 = vpop.f32.mrb[37].mxu0 }
 0x1ef   : > { %v1196_v31 = vmax.f32 %v1188_v17, %v1195_v28  ;;  %1147 = vst.msk [vmem:[#allocation4 + $0xa0] sm:$0xff] %vm1126_vm10, %v1067_v29 }
 0x1f0   : > { %v2447_v25 = vpop.f32.mrb[38].mxu1 }
 0x1f1   : > { %v1201_v32 = vsel %vm1126_vm10, %v2447_v25, -inf  ;;  %v2503_v39 = vpop.f32.mrb[38].mxu0  ;;  %v848_v34 = vpop.f32.mrb[39].mxu1  ;;  %1241 = vxpose.xlu0.b32.cont [12/16] (narrow) %v3713_v21, 8 }
 0x1f2   : > { %v1202_v45 = vmax.f32 %v1194_v20, %v1201_v32  ;;  %1150 = vst.msk [vmem:[#allocation4 + $0xb8] sm:$0xff] %vm1126_vm10, %v2503_v39  ;;  %v1199_v36 = vsel %vm1126_vm10, %v848_v34, -inf  ;;  %v1077_v37 = vpop.f32.mrb[39].mxu0  ;;  %1265 = vxpose.xlu1.b32.cont [4/16] (narrow) %v2441_v12, 8 }
 0x1f3   : > { %v1200_v38 = vmax.f32 %v1192_v22, %v1199_v36  ;;  %1149 = vst.msk [vmem:[#allocation4 + $0xb0] sm:$0xff] %vm1126_vm10, %v1077_v37 }
 0x1f4   : > { %v2450_v41 = vpop.f32.mrb[40].mxu1 }
 0x1f5   : > { %v1205_v43 = vsel %vm1126_vm10, %v2450_v41, -inf  ;;  %v858_v44 = vpop.f32.mrb[41].mxu1  ;;  %v2506_v46 = vpop.f32.mrb[40].mxu0  ;;  %1242 = vxpose.xlu0.b32.cont [13/16] (narrow) %v3724_v63, 8 }
 0x1f6   : > { %v1206_v47 = vmax.f32 %v1198_v53, %v1205_v43  ;;  %v1203_v50 = vsel %vm1126_vm10, %v858_v44, -inf  ;;  %1266 = vxpose.xlu1.b32.cont [5/16] (narrow) %v838_v24, 8  ;;  %1152 = vst.msk [vmem:[#allocation4 + $0xc8] sm:$0xff] %vm1126_vm10, %v2506_v46  ;;  %v1087_v51 = vpop.f32.mrb[41].mxu0 }
 0x1f7   : > { %v1204_v52 = vmax.f32 %v1196_v31, %v1203_v50  ;;  %1151 = vst.msk [vmem:[#allocation4 + $0xc0] sm:$0xff] %vm1126_vm10, %v1087_v51 }
 0x1f8   : > { %v2453_v21 = vpop.f32.mrb[42].mxu1 }
 0x1f9   : > { %v1209_v54 = vsel %vm1126_vm10, %v2453_v21, -inf  ;;  %v868_v49 = vpop.f32.mrb[43].mxu1  ;;  %1243 = vxpose.xlu0.b32.cont [14/16] (narrow) %v3720_v58, 8  ;;  %v2509_v57 = vpop.f32.mrb[42].mxu0 }
 0x1fa   : > { %v1210_v55 = vmax.f32 %v1202_v45, %v1209_v54  ;;  %v1207_v56 = vsel %vm1126_vm10, %v868_v49, -inf  ;;  %1267 = vxpose.xlu1.b32.cont [6/16] (narrow) %v2444_v7, 8  ;;  %1154 = vst.msk [vmem:[#allocation4 + $0xd8] sm:$0xff] %vm1126_vm10, %v2509_v57  ;;  %v1097_v30 = vpop.f32.mrb[43].mxu0 }
 0x1fb   : > { %v1208_v6 = vmax.f32 %v1200_v38, %v1207_v56  ;;  %1153 = vst.msk [vmem:[#allocation4 + $0xd0] sm:$0xff] %vm1126_vm10, %v1097_v30 }
 0x1fc   : > { %v2456_v60 = vpop.f32.mrb[44].mxu1 }
 0x1fd   : > { %v1213_v62 = vsel %vm1126_vm10, %v2456_v60, -inf  ;;  %v878_v63 = vpop.f32.mrb[45].mxu1  ;;  %1244 = vxpose.xlu0.b32.cont [15/16] (narrow) %v3734_v35, 8  ;;  %v2512_v1 = vpop.f32.mrb[44].mxu0 }
 0x1fe   : > { %v1214_v59 = vmax.f32 %v1206_v47, %v1213_v62  ;;  %v1211_v42 = vsel %vm1126_vm10, %v878_v63, -inf  ;;  %1268 = vxpose.xlu1.b32.cont [7/16] (narrow) %v848_v34, 8  ;;  %1156 = vst.msk [vmem:[#allocation4 + $0xe8] sm:$0xff] %vm1126_vm10, %v2512_v1  ;;  %v1107_v27 = vpop.f32.mrb[45].mxu0 }
 0x1ff   : > { %v1212_v58 = vmax.f32 %v1204_v52, %v1211_v42  ;;  %1155 = vst.msk [vmem:[#allocation4 + $0xe0] sm:$0xff] %vm1126_vm10, %v1107_v27 }
 0x200   : > { %v2459_v3 = vpop.f32.mrb[46].mxu1 }
 0x201   : > { %v1219_v15 = vmax.f32 %v1212_v58, %v1214_v59  ;;  %v1217_v10 = vsel %vm1126_vm10, %v2459_v3, -inf  ;;  %v888_v4 = vpop.f32.mrb[47].mxu1  ;;  %1245 = vxpose.xlu0.b32.end [16/16] (narrow) %v3730_v2, 8  ;;  %v2515_v35 = vpop.f32.mrb[46].mxu0 }
 0x202   : > { %v1218_v8 = vmax.f32 %v1210_v55, %v1217_v10  ;;  %v1215_v9 = vsel %vm1126_vm10, %v888_v4, -inf  ;;  %1269 = vxpose.xlu1.b32.cont [8/16] (narrow) %v2447_v25, 8  ;;  %1158 = vst.msk [vmem:[#allocation4 + $0xf8] sm:$0xff] %vm1126_vm10, %v2515_v35  ;;  %v1117_v48 = vpop.f32.mrb[47].mxu0 }
 0x203   : > { %v1216_v61 = vmax.f32 %v1208_v6, %v1215_v9  ;;  %1157 = vst.msk [vmem:[#allocation4 + $0xf0] sm:$0xff] %vm1126_vm10, %v1117_v48 }
 0x205   : > { %v1220_v0 = vmax.f32 %v1216_v61, %v1218_v8 }
 0x206   : > { %1270 = vxpose.xlu1.b32.cont [9/16] (narrow) %v858_v44, 8 }
 0x207   : > { %v1221_v5 = vmax.f32 %v1219_v15, %v1220_v0 }
 0x209   : > { %v1222_v14 = vrot.slane %v1221_v5, 4 }
 0x20a   : > { %1271 = vxpose.xlu1.b32.cont [10/16] (narrow) %v2450_v41, 8 }
 0x20b   : > { %v1223_v11 = vmax.f32 %v1221_v5, %v1222_v14 }
 0x20d   : > { %v1224_v16 = vrot.slane %v1223_v11, 2 }
 0x20e   : > { %1272 = vxpose.xlu1.b32.cont [11/16] (narrow) %v868_v49, 8 }
 0x20f   : > { %v1225_v17 = vmax.f32 %v1223_v11, %v1224_v16 }
 0x211   : > { %v1226_v12 = vrot.slane %v1225_v17, 1 }
 0x212   : > { %1273 = vxpose.xlu1.b32.cont [12/16] (narrow) %v2453_v21, 8 }
 0x213   : > { %v1227_v2 = vmax.f32 %v1225_v17, %v1226_v12 }
 0x215   : > { %1229 = vst.msk [vmem:[#allocation5] sm:$0x1] %vm1228_vm11, %v1227_v2 }
 0x216   : > { %1274 = vxpose.xlu1.b32.cont [13/16] (narrow) %v878_v63, 8 }
 0x21a   : > { %1275 = vxpose.xlu1.b32.cont [14/16] (narrow) %v2456_v60, 8 }
 0x21e   : > { %1276 = vxpose.xlu1.b32.cont [15/16] (narrow) %v888_v4, 8 }
 0x222   : > { %1277 = vxpose.xlu1.b32.end [16/16] (narrow) %v2459_v3, 8 }
 0x245   : > { %v1246_v13 = vpop.trf.xlu0 }
 0x246   : > { %1294 = vst [vmem:[#allocation3] sm:$0xf] %v1246_v13 }
 0x266   : > { %v1278_v18 = vpop.trf.xlu1 }
 0x267   : > { %1553 = vst [vmem:[#allocation3 + $0x4] sm:$0xf] %v1278_v18 }
 0x268 PF: > { %p2225_p10 = scmp.ne.s32.totalorder %s2642_s24, 0 }
 0x269   : > { %vm1782_vm12 = vcmask (!%p2225_p10), 293888   ;;  %v2662_v33 = vmov (!%p2225_p10), 0.0  }
 0x26a   : > { %1781 = sbr.rel (%p2225_p10) target bundleno = 625 (0x271), region = 56  ;;  %1783 = vst.msk [vmem:[#allocation6] sm:$0xff] (!%p2225_p10), %vm1782_vm12, %v2662_v33 }
 0x271 PF: > { %s2226_s22 = sshll.u32 %s2646_s25, 3  ;;  %v2663_v20 = vmov 1   ;;  %v2664_v19 = vmov 0   ;;  %v2227_v40 = vld [vmem:[#allocation5] ss:$0 sm:$0xff]  ;;  %s2236_s21 = sshll.u32 %s2642_s24, 8  ;;  %v1807_v1 = vlaneseq }
 0x272   : > { %2597 = vset.pattern.permute.xlu0 %v2663_v20  ;;  %2599 = vset.pattern.permute.xlu1 %v2664_v19  ;;  %s1787_s20 = scalar_lea.vmem [#allocation4], %s2226_s22  ;;  %s3781_s23 = scalar_lea.vmem [#allocation2], %s2236_s21  ;;  %v2665_v29 = vmov 2   ;;  %v2666_v31 = vmov 3   ;;  %vm2001_vm13 = vcmask 293888  }
 0x273   : > { %v1788_v22 = vld [vmem:[%s1787_s20] sm:$0xff]  ;;  %v1913_v25 = vld [vmem:[%s3781_s23 + $0xc8] sm:$0xff]  ;;  %v1914_v36 = vld [vmem:[%s3781_s23 + $0xd0] sm:$0xff]  ;;  %s2228_s25 = sshll.u32 %s2642_s24, 2  ;;  %v1808_v58 = vshrl.u32 %v1807_v1, 7  ;;  %p2231_p11 = scmp.ne.s32.totalorder %s2642_s24, 1 }
 0x274   : > { %1804 = vperm.xlu1 %2599, %v1788_v22   ;;  %1824 = vperm.xlu0 %2597, %v1788_v22   ;;  %v1796_v7 = vadd.f32 %v2227_v40, %v1788_v22  ;;  %v1912_v23 = vld [vmem:[%s3781_s23 + $0xc0] sm:$0xff]  ;;  %v1897_v39 = vld [vmem:[%s3781_s23 + $0x48] sm:$0xff]  ;;  %v1898_v37 = vld [vmem:[%s3781_s23 + $0x50] sm:$0xff]  ;;  %s1800_s8 = scalar_lea.vmem [#allocation3], %s2228_s25  ;;  %vm2031_vm14 = vcmask (!%p2231_p11), 64512   ;;  %vm2033_vm15 = vcmask (!%p2231_p11), 130048  }
 0x275   : > { %v1896_v24 = vld [vmem:[%s3781_s23 + $0x40] sm:$0xff]  ;;  %2348 = vmatprep.subr.bf16.mxu1 %v1912_v23  ;;  %v1905_v34 = vld [vmem:[%s3781_s23 + $0x88] sm:$0xff]  ;;  %v1906_v38 = vld [vmem:[%s3781_s23 + $0x90] sm:$0xff]  ;;  %v1829_v27 = vsub.s32 1, %v1808_v58  ;;  %v1809_v10 = vsub.s32 0, %v1808_v58  ;;  %v1848_v4 = vsub.s32 2, %v1808_v58 }
 0x276   : > { %v1904_v26 = vld [vmem:[%s3781_s23 + $0x80] sm:$0xff]  ;;  %v1797_v53 = vmul.f32 0.2, %v1796_v7  ;;  %2326 = vmatprep.subr.bf16.mxu0 %v1896_v24  ;;  %v1889_v45 = vld [vmem:[%s3781_s23 + $0x8] sm:$0xff]  ;;  %v1890_v41 = vld [vmem:[%s3781_s23 + $0x10] sm:$0xff]  ;;  %v1867_v8 = vsub.s32 3, %v1808_v58 }
 0x277   : > { %v1888_v28 = vld [vmem:[%s3781_s23] sm:$0xff]  ;;  %2349 = vmatpush3.bf16.msra.mxu1 %v1904_v26  ;;  %v1915_v43 = vld [vmem:[%s3781_s23 + $0xd8] sm:$0xff]  ;;  %v1917_v54 = vld [vmem:[%s3781_s23 + $0xe8] sm:$0xff]  ;;  %vm2035_vm0 = vcmask (!%p2231_p11), 195584   ;;  %vm2055_vm1 = vcmask (!%p2231_p11), 257024  }
 0x278   : > { %2327 = vmatpush3.bf16.msra.mxu0 %v1888_v28  ;;  %2600 = vset.pattern.permute.xlu1 %v2665_v29  ;;  %v1798_v32 = vmax.f32 %v1796_v7, %v1797_v53  ;;  %v1899_v44 = vld [vmem:[%s3781_s23 + $0x58] sm:$0xff]  ;;  %v1916_v50 = vld [vmem:[%s3781_s23 + $0xe0] sm:$0xff]  ;;  %v1901_v49 = vld [vmem:[%s3781_s23 + $0x68] sm:$0xff] }
 0x279   : > { %2598 = vset.pattern.permute.xlu0 %v2666_v31  ;;  %1843 = vperm.xlu1 %2600, %v1788_v22   ;;  %v1907_v46 = vld [vmem:[%s3781_s23 + $0x98] sm:$0xff]  ;;  %v1900_v51 = vld [vmem:[%s3781_s23 + $0x60] sm:$0xff]  ;;  %v1909_v55 = vld [vmem:[%s3781_s23 + $0xa8] sm:$0xff] }
 0x27a   : > { %1862 = vperm.xlu0 %2598, %v1788_v22   ;;  %2350 = vmatprep.subr.bf16.mxu1 %v1913_v25  ;;  %v1891_v47 = vld [vmem:[%s3781_s23 + $0x18] sm:$0xff]  ;;  %v1908_v52 = vld [vmem:[%s3781_s23 + $0xa0] sm:$0xff]  ;;  %v1893_v56 = vld [vmem:[%s3781_s23 + $0x28] sm:$0xff] }
 0x27b   : > { %2328 = vmatprep.subr.bf16.mxu0 %v1897_v39  ;;  %2351 = vmatpush3.bf16.msra.mxu1 %v1905_v34  ;;  %v1892_v21 = vld [vmem:[%s3781_s23 + $0x20] sm:$0xff]  ;;  %v1918_v57 = vld [vmem:[%s3781_s23 + $0xf0] sm:$0xff]  ;;  %v1919_v62 = vld [vmem:[%s3781_s23 + $0xf8] sm:$0xff] }
 0x27c   : > { %2329 = vmatpush3.bf16.msra.mxu0 %v1889_v45  ;;  %2352 = vmatprep.subr.bf16.mxu1 %v1914_v36  ;;  %v1902_v6 = vld [vmem:[%s3781_s23 + $0x70] sm:$0xff]  ;;  %v1903_v63 = vld [vmem:[%s3781_s23 + $0x78] sm:$0xff]  ;;  %v1801_v3 = vld [vmem:[%s1800_s8] sm:$0xf] }
 0x27d   : > { %2601 = vset.pattern.permute.xlu1 %v2663_v20  ;;  %2330 = vmatprep.subr.bf16.mxu0 %v1898_v37  ;;  %v1910_v30 = vld [vmem:[%s3781_s23 + $0xb0] sm:$0xff]  ;;  %v1911_v59 = vld [vmem:[%s3781_s23 + $0xb8] sm:$0xff]  ;;  %v1830_v15 = vrot.slane %v1801_v3, %v1829_v27  ;;  %v1810_v48 = vrot.slane %v1801_v3, %v1809_v10  ;;  %v1849_v0 = vrot.slane %v1801_v3, %v1848_v4  ;;  %v1785_v45 = vld [vmem:[%s2759_s19] sm:$0xf]  ;;  %v2668_v10 = vmov (!%p2231_p11), 34  }
 0x27e   : > { %1873 = vperm.xlu0 %2598, %v1798_v32   ;;  %1835 = vperm.xlu1 %2601, %v1798_v32   ;;  %v1894_v60 = vld [vmem:[%s3781_s23 + $0x30] sm:$0xff]  ;;  %v1895_v42 = vld [vmem:[%s3781_s23 + $0x38] sm:$0xff]  ;;  %v1868_v5 = vrot.slane %v1801_v3, %v1867_v8  ;;  %v1786_v36 = vunpack.c.l.bf16 %v1785_v45  ;;  %v2667_v3 = vmov (!%p2231_p11), 32   ;;  %v2669_v8 = vmov (!%p2231_p11), 33  }
 0x27f   : > { %2353 = vmatpush3.bf16.msra.mxu1 %v1906_v38 }
 0x280   : > { %2331 = vmatpush3.bf16.msra.mxu0 %v1890_v41  ;;  %2354 = vmatprep.subr.bf16.mxu1 %v1915_v43 }
 0x281   : > { %2332 = vmatprep.subr.bf16.mxu0 %v1899_v44 }
 0x282   : > { %2603 = vset.pattern.permute.xlu0 %v2665_v29  ;;  %2602 = vset.pattern.permute.xlu1 %v2664_v19 }
 0x283   : > { %1854 = vperm.xlu0 %2603, %v1798_v32   ;;  %1816 = vperm.xlu1 %2602, %v1798_v32  }
 0x284   : > { %2355 = vmatpush3.bf16.msra.mxu1 %v1907_v46  ;;  %2333 = vmatpush3.bf16.msra.mxu0 %v1891_v47 }
 0x285   : > { %2356 = vmatprep.subr.bf16.mxu1 %v1916_v50  ;;  %2334 = vmatprep.subr.bf16.mxu0 %v1900_v51 }
 0x287   : > { %2604 = vset.pattern.permute.xlu0 %v2666_v31  ;;  %2615 = vset.pattern.permute.xlu1 (!%p2231_p11), %v2668_v10 }
 0x288   : > { %2357 = vmatpush3.bf16.msra.mxu1 %v1908_v52  ;;  %2335 = vmatpush3.bf16.msra.mxu0 %v1892_v21 }
 0x289   : > { %2358 = vmatprep.subr.bf16.mxu1 %v1917_v54  ;;  %2336 = vmatprep.subr.bf16.mxu0 %v1901_v49 }
 0x28a   : > { %2613 = vset.pattern.permute.xlu0 (!%p2231_p11), %v2667_v3 }
 0x28c   : > { %2359 = vmatpush3.bf16.msra.mxu1 %v1909_v55  ;;  %2337 = vmatpush3.bf16.msra.mxu0 %v1893_v56 }
 0x28d   : > { %2360 = vmatprep.subr.bf16.mxu1 %v1918_v57  ;;  %2338 = vmatprep.subr.bf16.mxu0 %v1902_v6 }
 0x290   : > { %2361 = vmatpush3.bf16.msra.mxu1 %v1910_v30  ;;  %2339 = vmatpush3.bf16.msra.mxu0 %v1894_v60 }
 0x291   : > { %2362 = vmatprep.subr.bf16.mxu1 %v1919_v62  ;;  %2340 = vmatprep.subr.bf16.mxu0 %v1903_v63 }
 0x294   : > { %2363 = vmatpush3.bf16.msra.mxu1 %v1911_v59  ;;  %2341 = vmatpush3.bf16.msra.mxu0 %v1895_v42  ;;  %v1880_v59 = vld [vmem:[#allocation6] sm:$0xff] }
 0x2f3   : > { %v1805_v9 = vpop.permute.xlu1 %1804  ;;  %v1825_v35 = vpop.permute.xlu0 %1824 }
 0x2f4   : > { %v1831_v61 = vadd.f32 %v1830_v15, %v1825_v35  ;;  %v1811_v17 = vadd.f32 %v1810_v48, %v1805_v9  ;;  %v2670_v9 = vmov (!%p2231_p11), 35  }
 0x2f6   : > { %v1832_v14 = vmul.f32 0.2, %v1831_v61  ;;  %v1812_v19 = vmul.f32 0.2, %v1811_v17 }
 0x2f8   : > { %v1844_v11 = vpop.permute.xlu1 %1843  ;;  %v1833_v20 = vmax.f32 %v1831_v61, %v1832_v14  ;;  %v1813_v29 = vmax.f32 %v1811_v17, %v1812_v19 }
 0x2f9   : > { %v1863_v16 = vpop.permute.xlu0 %1862  ;;  %v1850_v12 = vadd.f32 %v1849_v0, %v1844_v11 }
 0x2fa   : > { %v1869_v2 = vadd.f32 %v1868_v5, %v1863_v16 }
 0x2fb   : > { %v1851_v18 = vmul.f32 0.2, %v1850_v12 }
 0x2fc   : > { %v1870_v13 = vmul.f32 0.2, %v1869_v2 }
 0x2fd   : > { %v1874_v33 = vpop.permute.xlu0 %1873  ;;  %v1836_v22 = vpop.permute.xlu1 %1835  ;;  %v1852_v26 = vmax.f32 %v1850_v12, %v1851_v18  ;;  %v2232_v12 = vld [vmem:[%s3845_s5] ss:$0 sm:$0xff] (!%p2231_p11) }
 0x2fe   : > { %v1871_v40 = vmax.f32 %v1869_v2, %v1870_v13  ;;  %v1838_v7 = vsub.f32 %v1833_v20, %v1836_v22  ;;  %v2233_v13 = vld [vmem:[%s3846_s6] ss:$0 sm:$0xff] (!%p2231_p11) }
 0x300   : > { %v1876_v23 = vsub.f32 %v1871_v40, %v1874_v33  ;;  %v1839_v24 = vmul.f32 1.442695, %v1838_v7 }
 0x302   : > { %v1877_v53 = vmul.f32 1.442695, %v1876_v23  ;;  %v1855_v28 = vpop.permute.xlu0 %1854  ;;  %2605 = vpow2.f32 %v1839_v24  ;;  %v1817_v25 = vpop.permute.xlu1 %1816 }
 0x303   : > { %v1857_v31 = vsub.f32 %v1852_v26, %v1855_v28  ;;  %v1819_v32 = vsub.f32 %v1813_v29, %v1817_v25 }
 0x304   : > { %2607 = vpow2.f32 %v1877_v53 }
 0x305   : > { %v1858_v39 = vmul.f32 1.442695, %v1857_v31  ;;  %v1820_v34 = vmul.f32 1.442695, %v1819_v32 }
 0x307   : > { %2609 = vpow2.f32 %v1858_v39 }
 0x308   : > { %2611 = vpow2.f32 %v1820_v34 }
 0x30c   : > { %v2606_v37 = vpop.eup %2605 }
 0x30d   : > { %v1841_v41 = vmul.f32 %v2606_v37, %v1786_v36 }
 0x30e   : > { %v2608_v38 = vpop.eup %2607 }
 0x30f   : > { %v1879_v43 = vmul.f32 %v2608_v38, %v1786_v36  ;;  %v1882_v44 = vpack.c.bf16 %v1841_v41, %v1841_v41 }
 0x311   : > { %v2610_v46 = vpop.eup %2609  ;;  %v1884_v47 = vpack.c.bf16 %v1879_v43, %v1879_v43  ;;  %1952 = vmatprep.mubr.bf16.mxu0 %v1882_v44 }
 0x312   : > { %v2612_v50 = vpop.eup %2611  ;;  %v1860_v51 = vmul.f32 %v2610_v46, %v1786_v36 }
 0x313   : > { %1992 = vmatprep.mubr.bf16.mxu1 %v1884_v47  ;;  %v1822_v52 = vmul.f32 %v2612_v50, %v1786_v36 }
 0x314   : > { %v1883_v21 = vpack.c.bf16 %v1860_v51, %v1860_v51 }
 0x315   : > { %v1881_v54 = vpack.c.bf16 %v1822_v52, %v1822_v52 }
 0x316   : > { %1993 = vmatmul.mubr.bf16.vlgmr.msra.gmra.mrb[0].mxu1 %v1883_v21 }
 0x317   : > { %1953 = vmatmul.mubr.bf16.vlgmr.msra.gmra.mrb[0].mxu0 %v1881_v54 }
 0x3e9   : > { %v2364_v49 = vpop.f32.mrb[0].mxu1 }
 0x3ea   : > { %v2342_v55 = vpop.f32.mrb[0].mxu0  ;;  %v2365_v56 = vpop.f32.mrb[1].mxu1 }
 0x3eb   : > { %v2366_v57 = vadd.f32 %v2365_v56, %v2364_v49  ;;  %v2343_v6 = vpop.f32.mrb[1].mxu0  ;;  %v2367_v30 = vpop.f32.mrb[2].mxu1 }
 0x3ec   : > { %v2344_v60 = vadd.f32 %v2343_v6, %v2342_v55  ;;  %v2345_v62 = vpop.f32.mrb[2].mxu0  ;;  %v2368_v63 = vpop.f32.mrb[3].mxu1  ;;  %2006 = sbr.rel (%p2231_p11) target bundleno = 1178 (0x49a), region = 60 }
 0x3ed   : > { %v2346_v42 = vpop.f32.mrb[3].mxu0 }
 0x3ee   : > { %v1995_v1 = vadd.f32 %v2366_v57, %v2344_v60 }
 0x3f0   : > { %v2000_v58 = vadd.f32 %v1995_v1, %v1880_v59 }
 0x3f2   : > { %2002 = vst.msk [vmem:[#allocation6] sm:$0xff] %vm2001_vm13, %v2000_v58 }
 0x3f9   : > { %v2007_v27 = vld [vmem:[#allocation6] sm:$0xff] }
 0x3fa   : > { %v2008_v15 = vmax.f32 %v2007_v27, 1e-09 }
 0x3fc   : > { %2618 = vrcp.f32 %v2008_v15 }
 0x406   : > { %v2619_v4 = vpop.eup %2618 }
 0x407   : > { %2012 = vperm.xlu0 %2613, %v2619_v4   ;;  %2022 = vperm.xlu1 %2615, %v2619_v4  }
 0x40b   : > { %2614 = vset.pattern.permute.xlu0 %v2669_v8  ;;  %2616 = vset.pattern.permute.xlu1 %v2670_v9 }
 0x40c   : > { %2017 = vperm.xlu0 %2614, %v2619_v4   ;;  %2027 = vperm.xlu1 %2616, %v2619_v4  }
 0x410   : > { %2617 = vset.pattern.permute.xlu0 %v2670_v9 }
 0x486   : > { %v2013_v35 = vpop.permute.xlu0 %2012  ;;  %v2023_v61 = vpop.permute.xlu1 %2022 }
 0x487   : > { %v2015_v5 = vmul.f32 %v2013_v35, %v2007_v27  ;;  %v2025_v16 = vmul.f32 %v2023_v61, %v2007_v27 }
 0x48b   : > { %v2018_v48 = vpop.permute.xlu0 %2017  ;;  %v2028_v0 = vpop.permute.xlu1 %2027 }
 0x48c   : > { %v2020_v14 = vmul.f32 %v2018_v48, %v2007_v27  ;;  %v2030_v11 = vmul.f32 %v2028_v0, %v2007_v27 }
 0x48e   : > { %v2032_v17 = vsel %vm2031_vm14, %v2015_v5, %v2020_v14 }
 0x48f   : > { %v2034_v2 = vsel %vm2033_vm15, %v2032_v17, %v2025_v16 }
 0x490   : > { %v2036_v18 = vsel %vm2035_vm0, %v2034_v2, %v2030_v11 }
 0x491   : > { %v2044_v33 = vmul.f32 %v2232_v12, %v2036_v18 }
 0x493   : > { %v2052_v20 = vadd.f32 %v2233_v13, %v2044_v33 }
 0x495   : > { %v2053_v19 = vmax.f32 %v2052_v20, 0.0 }
 0x497   : > { %v2054_v40 = vpack.c.bf16 %v2053_v19, %v2053_v19 }
 0x499   : > { %2056 = vst.msk [vmem:[%s2754_s15] sm:$0xf] %vm2055_vm1, %v2054_v40 }
 0x49a PF: > { %s17_s28 = sadd.s32 1, %s2658_s28   ;;  %s3848_s24 = smov %s2650_s26 }
 0x49b   : > { %p14_p12 = scmp.ge.s32.totalorder %s17_s28, 66   ;;  %s3849_s25 = smov %s2654_s27 }
 0x49c   : > { %s3850_s26 = smov %s3853_s29  ;;  %s3851_s27 = smov %s3857_s30 }
 0x49d   :  { %16 = sbr.rel (!%p14_p12) target bundleno = 3 (0x3), region = 95 }

</bundles_post_ra>
